<compile_context>
chip_gen: v5e
topology: v5e:2x2
jax: 0.10.0
libtpu: 0.0.40
codegen_flags: <defaults>
</compile_context>

<pallas_src>
import functools

import jax
import jax.numpy as jnp
from jax.experimental import pallas as pl
from jax.experimental.pallas import tpu as pltpu

LN_EPS = 1e-5  # PyTorch nn.LayerNorm default


def _layernorm(x, gb_ref):
    """LayerNorm over last dim in f32, biased variance (PyTorch style)."""
    mean = jnp.mean(x, axis=-1, keepdims=True)
    cen = x - mean
    var = jnp.mean(cen * cen, axis=-1, keepdims=True)
    xn = cen * jax.lax.rsqrt(var + LN_EPS)
    return xn * gb_ref[0:1, :] + gb_ref[1:2, :]


def _erf(x):
    # Abramowitz & Stegun 7.1.26 (max abs error 1.5e-7): only exp/mul/add/where,
    # so it lowers on every TPU generation without relying on an erf primitive.
    ax = jnp.abs(x)
    t = 1.0 / (1.0 + 0.3275911 * ax)
    poly = t * (0.254829592 + t * (-0.284496736 + t * (1.421413741
               + t * (-1.453152027 + t * 1.061405429))))
    e = 1.0 - poly * jnp.exp(-ax * ax)
    return jnp.where(x < 0.0, -e, e)


def _gelu_exact(x):
    # PyTorch nn.GELU() default (approximate='none'): x * Phi(x).
    return 0.5 * x * (1.0 + _erf(x * 0.7071067811865476))


def encoder_block_kernel(x_ref,
                         ln1_ref, wq_ref, bq_ref, wkv_ref, bkv_ref,
                         wp_ref, bp_ref,
                         ln2_ref, w1_ref, b1_ref, w2_ref, b2_ref,
                         o_ref,
                         kv_scr, att_scr,
                         *, num_heads, q_tile, seq_valid, compute_dtype):
    cdt = compute_dtype
    seq_pad, emb = x_ref.shape          # full (padded) sequence slab
    hs = emb // num_heads
    tq = q_tile
    qi = pl.program_id(1)

    # ---- K/V side: LN1 + fused (E -> 2E) GEMM, computed ONCE per batch
    #      element (qi == 0) and cached in a persistent VMEM scratch. ----
    @pl.when(qi == 0)
    def _():
        x_all = x_ref[...].astype(jnp.float32)                       # (T, E)
        xn_all = _layernorm(x_all, ln1_ref)
        kv = jnp.dot(xn_all.astype(cdt), wkv_ref[...],
                     preferred_element_type=jnp.float32) + bkv_ref[...]
        kv_scr[...] = kv.astype(kv_scr.dtype)                        # (T, 2E)

    # ---- query tile sliced from the resident slab (no second x input) ----
    start = pl.multiple_of(qi * tq, tq)
    xq = x_ref[pl.ds(start, tq), :].astype(jnp.float32)              # (TQ, E)

    xn_q = _layernorm(xq, ln1_ref)
    q = jnp.dot(xn_q.astype(cdt), wq_ref[...],
                preferred_element_type=jnp.float32) + bq_ref[...]    # (TQ, E)
    q = q * (float(hs) ** -0.5)        # fold 1/sqrt(hs) into the small q slab

    if seq_pad != seq_valid:           # static: only when wrapper padded T
        kmask = jax.lax.broadcasted_iota(jnp.int32, (1, seq_pad), 1) < seq_valid
    else:
        kmask = None

    # ---- per-head attention, no (H, TQ, HS) relayouts: each head reads lane
    #      slices of q / kv_scr and writes its (TQ, HS) result into the lane
    #      slice of a lane-dense (TQ, E) f32 accumulator scratch. ----
    for h in range(num_heads):
        lo, hi = h * hs, (h + 1) * hs
        qh = q[:, lo:hi].astype(cdt)                                 # (TQ, HS)
        kh = kv_scr[:, lo:hi]                                        # (T,  HS)
        vh = kv_scr[:, emb + lo:emb + hi]                            # (T,  HS)

        s = jax.lax.dot_general(qh, kh, (((1,), (1,)), ((), ())),
                                preferred_element_type=jnp.float32)  # (TQ, T)
        if kmask is not None:
            s = jnp.where(kmask, s, -1e30)
        s = s - jnp.max(s, axis=-1, keepdims=True)
        p = jnp.exp(s)
        l = jnp.sum(p, axis=-1, keepdims=True)
        inv_l = pl.reciprocal(l, approx=True)      # EUP slot (essentially free)
        inv_l = inv_l * (2.0 - l * inv_l)          # Newton step -> f32 accuracy

        o_h = jnp.dot(p.astype(cdt), vh,
                      preferred_element_type=jnp.float32)            # (TQ, HS)
        att_scr[:, lo:hi] = o_h * inv_l            # normalize the small tensor

    msa = jnp.dot(att_scr[...].astype(cdt), wp_ref[...],
                  preferred_element_type=jnp.float32) + bp_ref[...]
    y = msa + xq                                                     # residual 1

    # ---- MLP block (LN2 -> Linear -> GELU -> Linear) ----
    yn = _layernorm(y, ln2_ref)
    h1 = jnp.dot(yn.astype(cdt), w1_ref[...],
                 preferred_element_type=jnp.float32) + b1_ref[...]
    h1 = _gelu_exact(h1)
    h2 = jnp.dot(h1.astype(cdt), w2_ref[...],
                 preferred_element_type=jnp.float32) + b2_ref[...]
    o_ref[...] = (h2 + y).astype(o_ref.dtype)                        # residual 2


def transformer_encoder_block(x, params, num_heads, *, q_tile=256,
                              compute_dtype=jnp.bfloat16):
    """x -> MSA(LN1(x)) + x -> MLP(LN2(.)) + .   (q_tile: 256 v6e/v7x, 128 v5e)"""
    B, T, E = x.shape
    assert E % num_heads == 0
    (ln1_g, ln1_b, wq, bq, wk, bk, wv, bv, wp, bp,
     ln2_g, ln2_b, w1, b1, w2, b2) = params

    f32 = jnp.float32
    # --- pack per-head weights into a few lane-dense, full-resident operands ---
    ln1 = jnp.concatenate([ln1_g, ln1_b], axis=0).astype(f32)            # (2, E)
    ln2 = jnp.concatenate([ln2_g, ln2_b], axis=0).astype(f32)            # (2, E)
    w_q = jnp.transpose(wq, (1, 0, 2)).reshape(E, E)                     # (E, E)
    b_q = bq.reshape(1, E).astype(f32)
    w_kv = jnp.concatenate([jnp.transpose(wk, (1, 0, 2)).reshape(E, E),
                            jnp.transpose(wv, (1, 0, 2)).reshape(E, E)],
                           axis=-1)                                      # (E, 2E)
    b_kv = jnp.concatenate([bk.reshape(1, E), bv.reshape(1, E)],
                           axis=-1).astype(f32)                          # (1, 2E)
    M = w1.shape[-1]
    cast = lambda w: w.astype(compute_dtype)   # bf16 weights halve weight DMA/VMEM
    w_q, w_kv, w_p, w_1, w_2 = map(cast, (w_q, w_kv, wp, w1, w2))
    b_p, b_1, b_2 = bp.astype(f32), b1.astype(f32), b2.astype(f32)

    # --- query tiling; pad T so every tile is full and slicing never goes OOB ---
    TQ = min(q_tile, T)
    n_q = pl.cdiv(T, TQ)
    T_pad = n_q * TQ
    x_in = x if T_pad == T else jnp.pad(x, ((0, 0), (0, T_pad - T), (0, 0)))

    grid = (B, n_q)
    kernel = functools.partial(encoder_block_kernel,
                               num_heads=num_heads, q_tile=TQ,
                               seq_valid=T, compute_dtype=compute_dtype)

    # --- VMEM budget: raise the scoped limit (16 MiB default on v5e), but keep
    #     the request <= 64 MiB so it also fits v7x's physical VMEM. ---
    cdt_bytes = jnp.dtype(compute_dtype).itemsize
    est = (2 * T_pad * E * x.dtype.itemsize            # double-buffered x slab
           + T_pad * 2 * E * cdt_bytes                 # persistent K/V scratch
           + 2 * (4 * E * E + 2 * E * M) * cdt_bytes   # weights (<=2 buffers)
           + 8 * TQ * max(E, M, T_pad) * 4             # activation headroom
           + (2 << 20))
    vmem_limit = int(min(64 << 20, max(32 << 20, est)))

    scratch = [pltpu.VMEM((T_pad, 2 * E), compute_dtype),   # cached K/V
               pltpu.VMEM((TQ, E), jnp.float32)]            # attention output slab

    consts = (ln1, w_q, b_q, w_kv, b_kv, w_p, b_p, ln2, w_1, b_1, w_2, b_2)

    def build(single_buffer_consts):
        def const_spec(arr):
            zeros = (0,) * arr.ndim
            if single_buffer_consts:
                # constants never change across the grid: single-buffer them.
                return pl.BlockSpec(arr.shape, lambda b, qi: zeros,
                                    pipeline_mode=pl.Buffered(1))
            return pl.BlockSpec(arr.shape, lambda b, qi: zeros)

        return pl.pallas_call(
            kernel,
            out_shape=jax.ShapeDtypeStruct((B, T_pad, E), x.dtype),
            grid_spec=pltpu.PrefetchScalarGridSpec(
                num_scalar_prefetch=0,
                grid=grid,
                in_specs=[
                    # full (padded) sequence of this batch element; re-DMA'd
                    # only when the batch index changes.
                    pl.BlockSpec((None, T_pad, E), lambda b, qi: (b, 0, 0)),
                ] + [const_spec(a) for a in consts],
                out_specs=pl.BlockSpec((None, TQ, E), lambda b, qi: (b, qi, 0)),
                scratch_shapes=scratch),
            compiler_params=pltpu.CompilerParams(
                # batch "parallel" (megacore shards on batch); qi "arbitrary"
                # because the K/V scratch is carried across query tiles.
                dimension_semantics=("parallel", "arbitrary"),
                vmem_limit_bytes=vmem_limit),
        )

    try:
        out = build(True)(x_in, *consts)
    except Exception:   # fall back if single-buffered pipeline_mode unsupported
        out = build(False)(x_in, *consts)
    return out if T_pad == T else out[:, :T, :]


def reference(x, params, num_heads):
    """Pure-JAX reference mirroring the PyTorch Transformer_Encoder_Block."""
    (ln1_g, ln1_b, wq, bq, wk, bk, wv, bv, wp, bp,
     ln2_g, ln2_b, w1, b1, w2, b2) = params

    def ln(t, g, b_):
        m = jnp.mean(t, axis=-1, keepdims=True)
        v = jnp.mean((t - m) ** 2, axis=-1, keepdims=True)
        return (t - m) / jnp.sqrt(v + LN_EPS) * g[0] + b_[0]

    xn = ln(x, ln1_g, ln1_b)
    outs = []
    for h in range(num_heads):
        q = xn @ wq[h] + bq[h]
        k = xn @ wk[h] + bk[h]
        v = xn @ wv[h] + bv[h]
        s = (q @ jnp.swapaxes(k, -2, -1)) * (k.shape[-1] ** -0.5)
        outs.append(jax.nn.softmax(s, axis=-1) @ v)
    y = jnp.concatenate(outs, axis=-1) @ wp + bp[0] + x
    yn = ln(y, ln2_g, ln2_b)
    h1 = jax.nn.gelu(yn @ w1 + b1[0], approximate=False)
    return h1 @ w2 + b2[0] + y


if __name__ == "__main__":
    B, T, E, H, M = 2, 8, 32, 4, 64
    HS = E // H
    key = jax.random.PRNGKey(0)
    ks = jax.random.split(key, 20)
    x = jax.random.normal(ks[0], (B, T, E), jnp.float32)

    s = 0.05
    ln1_g = 1.0 + 0.1 * jax.random.normal(ks[1], (1, E), jnp.float32)
    ln1_b = 0.1 * jax.random.normal(ks[2], (1, E), jnp.float32)
    wq = s * jax.random.normal(ks[3], (H, E, HS), jnp.float32)
    bq = s * jax.random.normal(ks[4], (H, 1, HS), jnp.float32)
    wk = s * jax.random.normal(ks[5], (H, E, HS), jnp.float32)
    bk = s * jax.random.normal(ks[6], (H, 1, HS), jnp.float32)
    wv = s * jax.random.normal(ks[7], (H, E, HS), jnp.float32)
    bv = s * jax.random.normal(ks[8], (H, 1, HS), jnp.float32)
    wp = s * jax.random.normal(ks[9], (E, E), jnp.float32)
    bp = s * jax.random.normal(ks[10], (1, E), jnp.float32)
    ln2_g = 1.0 + 0.1 * jax.random.normal(ks[11], (1, E), jnp.float32)
    ln2_b = 0.1 * jax.random.normal(ks[12], (1, E), jnp.float32)
    w1 = s * jax.random.normal(ks[13], (E, M), jnp.float32)
    b1 = s * jax.random.normal(ks[14], (1, M), jnp.float32)
    w2 = s * jax.random.normal(ks[15], (M, E), jnp.float32)
    b2 = s * jax.random.normal(ks[16], (1, E), jnp.float32)
    params = (ln1_g, ln1_b, wq, bq, wk, bk, wv, bv, wp, bp,
              ln2_g, ln2_b, w1, b1, w2, b2)

    ref = reference(x, params, num_heads=H)

    # f32 MXU-operand path: tight tolerance against the exact reference.
    out = transformer_encoder_block(x, params, num_heads=H,
                                    compute_dtype=jnp.float32)
    out = jax.block_until_ready(out)
    assert out.shape == (B, T, E)
    assert jnp.allclose(out, ref, atol=1e-4, rtol=1e-4), \
        float(jnp.max(jnp.abs(out - ref)))

    # Default bf16 MXU-operand path (f32 accumulation): looser tolerance.
    out_bf16 = transformer_encoder_block(x, params, num_heads=H)
    out_bf16 = jax.block_until_ready(out_bf16)
    assert jnp.allclose(out_bf16, ref, atol=5e-2, rtol=5e-2), \
        float(jnp.max(jnp.abs(out_bf16 - ref)))

    # Ragged sequence (T % q_tile != 0): exercises padding + key mask + multi-tile
    # KV-scratch reuse (qi > 0 reads cached K/V).
    T2 = 12
    x2 = jax.random.normal(ks[17], (1, T2, E), jnp.float32)
    ref2 = reference(x2, params, num_heads=H)
    out2 = transformer_encoder_block(x2, params, num_heads=H, q_tile=8,
                                     compute_dtype=jnp.float32)
    out2 = jax.block_until_ready(out2)
    assert out2.shape == (1, T2, E)
    assert jnp.allclose(out2, ref2, atol=1e-4, rtol=1e-4), \
        float(jnp.max(jnp.abs(out2 - ref2)))

    print("KERNEL_OK")
</pallas_src>

<mosaic_0001>
module attributes {stable_mosaic.version = 11 : i64} {
  func.func @encoder_block_kernel(%arg0: i32, %arg1: i32, %arg2: memref<1x8x32xf32, #tpu.memory_space<vmem>>, %arg3: memref<2x32xf32, #tpu.memory_space<vmem>>, %arg4: memref<32x32xf32, #tpu.memory_space<vmem>>, %arg5: memref<1x32xf32, #tpu.memory_space<vmem>>, %arg6: memref<32x64xf32, #tpu.memory_space<vmem>>, %arg7: memref<1x64xf32, #tpu.memory_space<vmem>>, %arg8: memref<32x32xf32, #tpu.memory_space<vmem>>, %arg9: memref<1x32xf32, #tpu.memory_space<vmem>>, %arg10: memref<2x32xf32, #tpu.memory_space<vmem>>, %arg11: memref<32x64xf32, #tpu.memory_space<vmem>>, %arg12: memref<1x64xf32, #tpu.memory_space<vmem>>, %arg13: memref<64x32xf32, #tpu.memory_space<vmem>>, %arg14: memref<1x32xf32, #tpu.memory_space<vmem>>, %arg15: memref<1x8x32xf32, #tpu.memory_space<vmem>>, %arg16: memref<8x64xf32, #tpu.memory_space<vmem>>, %arg17: memref<8x32xf32, #tpu.memory_space<vmem>>) attributes {dimension_semantics = [#tpu.dimension_semantics<parallel>, #tpu.dimension_semantics<arbitrary>], iteration_bounds = array<i64: 2, 1>, scalar_prefetch = 0 : i64, scratch_operands = 2 : i64, tpu.core_type = #tpu.core_type<tc>, window_params = [{transform_indices = @transform_0, window_bounds = array<i64: 1, 8, 32>}, {pipeline_mode = #tpu.pipeline_mode<synchronous>, transform_indices = @transform_1, window_bounds = array<i64: 2, 32>}, {pipeline_mode = #tpu.pipeline_mode<synchronous>, transform_indices = @transform_2, window_bounds = array<i64: 32, 32>}, {pipeline_mode = #tpu.pipeline_mode<synchronous>, transform_indices = @transform_3, window_bounds = array<i64: 1, 32>}, {pipeline_mode = #tpu.pipeline_mode<synchronous>, transform_indices = @transform_4, window_bounds = array<i64: 32, 64>}, {pipeline_mode = #tpu.pipeline_mode<synchronous>, transform_indices = @transform_5, window_bounds = array<i64: 1, 64>}, {pipeline_mode = #tpu.pipeline_mode<synchronous>, transform_indices = @transform_6, window_bounds = array<i64: 32, 32>}, {pipeline_mode = #tpu.pipeline_mode<synchronous>, transform_indices = @transform_7, window_bounds = array<i64: 1, 32>}, {pipeline_mode = #tpu.pipeline_mode<synchronous>, transform_indices = @transform_8, window_bounds = array<i64: 2, 32>}, {pipeline_mode = #tpu.pipeline_mode<synchronous>, transform_indices = @transform_9, window_bounds = array<i64: 32, 64>}, {pipeline_mode = #tpu.pipeline_mode<synchronous>, transform_indices = @transform_10, window_bounds = array<i64: 1, 64>}, {pipeline_mode = #tpu.pipeline_mode<synchronous>, transform_indices = @transform_11, window_bounds = array<i64: 64, 32>}, {pipeline_mode = #tpu.pipeline_mode<synchronous>, transform_indices = @transform_12, window_bounds = array<i64: 1, 32>}, {transform_indices = @transform_13, window_bounds = array<i64: 1, 8, 32>}]} {
    %c0_i32 = arith.constant 0 : i32
    %0 = arith.cmpi eq, %arg1, %c0_i32 : i32
    %1 = arith.extui %0 : i1 to i32
    %c0_i32_0 = arith.constant 0 : i32
    %2 = arith.cmpi ne, %1, %c0_i32_0 : i32
    scf.if %2 {
      %c0_96 = arith.constant 0 : index
      %c0_97 = arith.constant 0 : index
      %c0_98 = arith.constant 0 : index
      %200 = vector.load %arg2[%c0_96, %c0_97, %c0_98] : memref<1x8x32xf32, #tpu.memory_space<vmem>>, vector<1x8x32xf32>
      %201 = vector.shape_cast %200 : vector<1x8x32xf32> to vector<8x32xf32>
      %cst_99 = arith.constant dense<0.000000e+00> : vector<8xf32>
      %202 = vector.multi_reduction <add>, %201, %cst_99 [1] : vector<8x32xf32> to vector<8xf32>
      %203 = vector.shape_cast %202 : vector<8xf32> to vector<8x1xf32>
      %cst_100 = arith.constant 3.200000e+01 : f32
      %204 = vector.broadcast %cst_100 : f32 to vector<8x1xf32>
      %205 = arith.divf %203, %204 : vector<8x1xf32>
      %206 = vector.broadcast %205 : vector<8x1xf32> to vector<8x32xf32>
      %207 = arith.subf %201, %206 : vector<8x32xf32>
      %208 = arith.mulf %207, %207 : vector<8x32xf32>
      %cst_101 = arith.constant dense<0.000000e+00> : vector<8xf32>
      %209 = vector.multi_reduction <add>, %208, %cst_101 [1] : vector<8x32xf32> to vector<8xf32>
      %210 = vector.shape_cast %209 : vector<8xf32> to vector<8x1xf32>
      %cst_102 = arith.constant 3.200000e+01 : f32
      %211 = vector.broadcast %cst_102 : f32 to vector<8x1xf32>
      %212 = arith.divf %210, %211 : vector<8x1xf32>
      %cst_103 = arith.constant 9.99999974E-6 : f32
      %213 = vector.broadcast %cst_103 : f32 to vector<8x1xf32>
      %214 = arith.addf %212, %213 : vector<8x1xf32>
      %215 = math.rsqrt %214 : vector<8x1xf32>
      %216 = vector.broadcast %215 : vector<8x1xf32> to vector<8x32xf32>
      %217 = arith.mulf %207, %216 : vector<8x32xf32>
      %c0_104 = arith.constant 0 : index
      %c0_105 = arith.constant 0 : index
      %218 = vector.load %arg3[%c0_104, %c0_105] : memref<2x32xf32, #tpu.memory_space<vmem>>, vector<1x32xf32>
      %219 = vector.broadcast %218 : vector<1x32xf32> to vector<8x32xf32>
      %220 = arith.mulf %217, %219 : vector<8x32xf32>
      %c1_106 = arith.constant 1 : index
      %c0_107 = arith.constant 0 : index
      %221 = vector.load %arg3[%c1_106, %c0_107] : memref<2x32xf32, #tpu.memory_space<vmem>>, vector<1x32xf32>
      %222 = vector.broadcast %221 : vector<1x32xf32> to vector<8x32xf32>
      %223 = arith.addf %220, %222 : vector<8x32xf32>
      %c0_108 = arith.constant 0 : index
      %c0_109 = arith.constant 0 : index
      %224 = vector.load %arg6[%c0_108, %c0_109] : memref<32x64xf32, #tpu.memory_space<vmem>>, vector<32x64xf32>
      %cst_110 = arith.constant dense<0.000000e+00> : vector<8x64xf32>
      %225 = tpu.matmul %223, %224, %cst_110 {dimension_numbers = #tpu.dot_dimension_numbers<[1], [0], [0], [1], [0, 0, 1, 1], [], []>} : vector<8x32xf32>, vector<32x64xf32>, vector<8x64xf32> -> vector<8x64xf32>
      %c0_111 = arith.constant 0 : index
      %c0_112 = arith.constant 0 : index
      %226 = vector.load %arg7[%c0_111, %c0_112] : memref<1x64xf32, #tpu.memory_space<vmem>>, vector<1x64xf32>
      %227 = vector.broadcast %226 : vector<1x64xf32> to vector<8x64xf32>
      %228 = arith.addf %225, %227 : vector<8x64xf32>
      %c0_113 = arith.constant 0 : index
      %c0_114 = arith.constant 0 : index
      %229 = vector.load %arg16[%c0_113, %c0_114] : memref<8x64xf32, #tpu.memory_space<vmem>>, vector<8x64xf32>
      tpu.vector_store %arg16[%c0_113, %c0_114], %228 {strides = array<i32>} : memref<8x64xf32, #tpu.memory_space<vmem>>, vector<8x64xf32>,
    } else {
    }
    %c8_i32 = arith.constant 8 : i32
    %3 = arith.muli %arg1, %c8_i32 : i32
    %4 = tpu.assume_multiple %3, 8 : i32
    %c0 = arith.constant 0 : index
    %5 = arith.index_cast %4 : i32 to index
    %c0_1 = arith.constant 0 : index
    %6 = vector.load %arg2[%c0, %5, %c0_1] : memref<1x8x32xf32, #tpu.memory_space<vmem>>, vector<1x8x32xf32>
    %7 = vector.shape_cast %6 : vector<1x8x32xf32> to vector<8x32xf32>
    %cst = arith.constant dense<0.000000e+00> : vector<8xf32>
    %8 = vector.multi_reduction <add>, %7, %cst [1] : vector<8x32xf32> to vector<8xf32>
    %9 = vector.shape_cast %8 : vector<8xf32> to vector<8x1xf32>
    %cst_2 = arith.constant 3.200000e+01 : f32
    %10 = vector.broadcast %cst_2 : f32 to vector<8x1xf32>
    %11 = arith.divf %9, %10 : vector<8x1xf32>
    %12 = vector.broadcast %11 : vector<8x1xf32> to vector<8x32xf32>
    %13 = arith.subf %7, %12 : vector<8x32xf32>
    %14 = arith.mulf %13, %13 : vector<8x32xf32>
    %cst_3 = arith.constant dense<0.000000e+00> : vector<8xf32>
    %15 = vector.multi_reduction <add>, %14, %cst_3 [1] : vector<8x32xf32> to vector<8xf32>
    %16 = vector.shape_cast %15 : vector<8xf32> to vector<8x1xf32>
    %cst_4 = arith.constant 3.200000e+01 : f32
    %17 = vector.broadcast %cst_4 : f32 to vector<8x1xf32>
    %18 = arith.divf %16, %17 : vector<8x1xf32>
    %cst_5 = arith.constant 9.99999974E-6 : f32
    %19 = vector.broadcast %cst_5 : f32 to vector<8x1xf32>
    %20 = arith.addf %18, %19 : vector<8x1xf32>
    %21 = math.rsqrt %20 : vector<8x1xf32>
    %22 = vector.broadcast %21 : vector<8x1xf32> to vector<8x32xf32>
    %23 = arith.mulf %13, %22 : vector<8x32xf32>
    %c0_6 = arith.constant 0 : index
    %c0_7 = arith.constant 0 : index
    %24 = vector.load %arg3[%c0_6, %c0_7] : memref<2x32xf32, #tpu.memory_space<vmem>>, vector<1x32xf32>
    %25 = vector.broadcast %24 : vector<1x32xf32> to vector<8x32xf32>
    %26 = arith.mulf %23, %25 : vector<8x32xf32>
    %c1 = arith.constant 1 : index
    %c0_8 = arith.constant 0 : index
    %27 = vector.load %arg3[%c1, %c0_8] : memref<2x32xf32, #tpu.memory_space<vmem>>, vector<1x32xf32>
    %28 = vector.broadcast %27 : vector<1x32xf32> to vector<8x32xf32>
    %29 = arith.addf %26, %28 : vector<8x32xf32>
    %c0_9 = arith.constant 0 : index
    %c0_10 = arith.constant 0 : index
    %30 = vector.load %arg4[%c0_9, %c0_10] : memref<32x32xf32, #tpu.memory_space<vmem>>, vector<32x32xf32>
    %cst_11 = arith.constant dense<0.000000e+00> : vector<8x32xf32>
    %31 = tpu.matmul %29, %30, %cst_11 {dimension_numbers = #tpu.dot_dimension_numbers<[1], [0], [0], [1], [0, 0, 1, 1], [], []>} : vector<8x32xf32>, vector<32x32xf32>, vector<8x32xf32> -> vector<8x32xf32>
    %c0_12 = arith.constant 0 : index
    %c0_13 = arith.constant 0 : index
    %32 = vector.load %arg5[%c0_12, %c0_13] : memref<1x32xf32, #tpu.memory_space<vmem>>, vector<1x32xf32>
    %33 = vector.broadcast %32 : vector<1x32xf32> to vector<8x32xf32>
    %34 = arith.addf %31, %33 : vector<8x32xf32>
    %cst_14 = arith.constant 0.353553385 : f32
    %35 = vector.broadcast %cst_14 : f32 to vector<8x32xf32>
    %36 = arith.mulf %34, %35 : vector<8x32xf32>
    %37 = vector.extract_strided_slice %36 {offsets = [0, 0], sizes = [8, 8], strides = [1, 1]} : vector<8x32xf32> to vector<8x8xf32>
    %c0_15 = arith.constant 0 : index
    %c0_16 = arith.constant 0 : index
    %38 = vector.load %arg16[%c0_15, %c0_16] : memref<8x64xf32, #tpu.memory_space<vmem>>, vector<8x8xf32>
    %c0_17 = arith.constant 0 : index
    %c32 = arith.constant 32 : index
    %39 = vector.load %arg16[%c0_17, %c32] : memref<8x64xf32, #tpu.memory_space<vmem>>, vector<8x8xf32>
    %cst_18 = arith.constant dense<0.000000e+00> : vector<8x8xf32>
    %40 = tpu.matmul %37, %38, %cst_18 {dimension_numbers = #tpu.dot_dimension_numbers<[1], [1], [0], [0], [0, 0, 1, 0], [], []>} : vector<8x8xf32>, vector<8x8xf32>, vector<8x8xf32> -> vector<8x8xf32>
    %cst_19 = arith.constant dense<0xFF800000> : vector<8xf32>
    %41 = vector.multi_reduction <maximumf>, %40, %cst_19 [1] : vector<8x8xf32> to vector<8xf32>
    %42 = vector.shape_cast %41 : vector<8xf32> to vector<8x1xf32>
    %43 = vector.broadcast %42 : vector<8x1xf32> to vector<8x8xf32>
    %44 = arith.subf %40, %43 : vector<8x8xf32>
    %45 = math.exp %44 : vector<8x8xf32>
    %cst_20 = arith.constant dense<0.000000e+00> : vector<8xf32>
    %46 = vector.multi_reduction <add>, %45, %cst_20 [1] : vector<8x8xf32> to vector<8xf32>
    %47 = vector.shape_cast %46 : vector<8xf32> to vector<8x1xf32>
    %48 = tpu.reciprocal %47 {approx = true} : vector<8x1xf32> -> vector<8x1xf32>
    %49 = arith.mulf %47, %48 : vector<8x1xf32>
    %cst_21 = arith.constant 2.000000e+00 : f32
    %50 = vector.broadcast %cst_21 : f32 to vector<8x1xf32>
    %51 = arith.subf %50, %49 : vector<8x1xf32>
    %52 = arith.mulf %48, %51 : vector<8x1xf32>
    %cst_22 = arith.constant dense<0.000000e+00> : vector<8x8xf32>
    %53 = tpu.matmul %45, %39, %cst_22 {dimension_numbers = #tpu.dot_dimension_numbers<[1], [0], [0], [1], [0, 0, 1, 1], [], []>} : vector<8x8xf32>, vector<8x8xf32>, vector<8x8xf32> -> vector<8x8xf32>
    %54 = vector.broadcast %52 : vector<8x1xf32> to vector<8x8xf32>
    %55 = arith.mulf %53, %54 : vector<8x8xf32>
    %c0_23 = arith.constant 0 : index
    %c0_24 = arith.constant 0 : index
    %56 = vector.load %arg17[%c0_23, %c0_24] : memref<8x32xf32, #tpu.memory_space<vmem>>, vector<8x8xf32>
    tpu.vector_store %arg17[%c0_23, %c0_24], %55 {strides = array<i32>} : memref<8x32xf32, #tpu.memory_space<vmem>>, vector<8x8xf32>,
    %57 = vector.extract_strided_slice %36 {offsets = [0, 8], sizes = [8, 8], strides = [1, 1]} : vector<8x32xf32> to vector<8x8xf32>
    %c0_25 = arith.constant 0 : index
    %c8 = arith.constant 8 : index
    %58 = vector.load %arg16[%c0_25, %c8] : memref<8x64xf32, #tpu.memory_space<vmem>>, vector<8x8xf32>
    %c0_26 = arith.constant 0 : index
    %c40 = arith.constant 40 : index
    %59 = vector.load %arg16[%c0_26, %c40] : memref<8x64xf32, #tpu.memory_space<vmem>>, vector<8x8xf32>
    %cst_27 = arith.constant dense<0.000000e+00> : vector<8x8xf32>
    %60 = tpu.matmul %57, %58, %cst_27 {dimension_numbers = #tpu.dot_dimension_numbers<[1], [1], [0], [0], [0, 0, 1, 0], [], []>} : vector<8x8xf32>, vector<8x8xf32>, vector<8x8xf32> -> vector<8x8xf32>
    %cst_28 = arith.constant dense<0xFF800000> : vector<8xf32>
    %61 = vector.multi_reduction <maximumf>, %60, %cst_28 [1] : vector<8x8xf32> to vector<8xf32>
    %62 = vector.shape_cast %61 : vector<8xf32> to vector<8x1xf32>
    %63 = vector.broadcast %62 : vector<8x1xf32> to vector<8x8xf32>
    %64 = arith.subf %60, %63 : vector<8x8xf32>
    %65 = math.exp %64 : vector<8x8xf32>
    %cst_29 = arith.constant dense<0.000000e+00> : vector<8xf32>
    %66 = vector.multi_reduction <add>, %65, %cst_29 [1] : vector<8x8xf32> to vector<8xf32>
    %67 = vector.shape_cast %66 : vector<8xf32> to vector<8x1xf32>
    %68 = tpu.reciprocal %67 {approx = true} : vector<8x1xf32> -> vector<8x1xf32>
    %69 = arith.mulf %67, %68 : vector<8x1xf32>
    %cst_30 = arith.constant 2.000000e+00 : f32
    %70 = vector.broadcast %cst_30 : f32 to vector<8x1xf32>
    %71 = arith.subf %70, %69 : vector<8x1xf32>
    %72 = arith.mulf %68, %71 : vector<8x1xf32>
    %cst_31 = arith.constant dense<0.000000e+00> : vector<8x8xf32>
    %73 = tpu.matmul %65, %59, %cst_31 {dimension_numbers = #tpu.dot_dimension_numbers<[1], [0], [0], [1], [0, 0, 1, 1], [], []>} : vector<8x8xf32>, vector<8x8xf32>, vector<8x8xf32> -> vector<8x8xf32>
    %74 = vector.broadcast %72 : vector<8x1xf32> to vector<8x8xf32>
    %75 = arith.mulf %73, %74 : vector<8x8xf32>
    %c0_32 = arith.constant 0 : index
    %c8_33 = arith.constant 8 : index
    %76 = vector.load %arg17[%c0_32, %c8_33] : memref<8x32xf32, #tpu.memory_space<vmem>>, vector<8x8xf32>
    tpu.vector_store %arg17[%c0_32, %c8_33], %75 {strides = array<i32>} : memref<8x32xf32, #tpu.memory_space<vmem>>, vector<8x8xf32>,
    %77 = vector.extract_strided_slice %36 {offsets = [0, 16], sizes = [8, 8], strides = [1, 1]} : vector<8x32xf32> to vector<8x8xf32>
    %c0_34 = arith.constant 0 : index
    %c16 = arith.constant 16 : index
    %78 = vector.load %arg16[%c0_34, %c16] : memref<8x64xf32, #tpu.memory_space<vmem>>, vector<8x8xf32>
    %c0_35 = arith.constant 0 : index
    %c48 = arith.constant 48 : index
    %79 = vector.load %arg16[%c0_35, %c48] : memref<8x64xf32, #tpu.memory_space<vmem>>, vector<8x8xf32>
    %cst_36 = arith.constant dense<0.000000e+00> : vector<8x8xf32>
    %80 = tpu.matmul %77, %78, %cst_36 {dimension_numbers = #tpu.dot_dimension_numbers<[1], [1], [0], [0], [0, 0, 1, 0], [], []>} : vector<8x8xf32>, vector<8x8xf32>, vector<8x8xf32> -> vector<8x8xf32>
    %cst_37 = arith.constant dense<0xFF800000> : vector<8xf32>
    %81 = vector.multi_reduction <maximumf>, %80, %cst_37 [1] : vector<8x8xf32> to vector<8xf32>
    %82 = vector.shape_cast %81 : vector<8xf32> to vector<8x1xf32>
    %83 = vector.broadcast %82 : vector<8x1xf32> to vector<8x8xf32>
    %84 = arith.subf %80, %83 : vector<8x8xf32>
    %85 = math.exp %84 : vector<8x8xf32>
    %cst_38 = arith.constant dense<0.000000e+00> : vector<8xf32>
    %86 = vector.multi_reduction <add>, %85, %cst_38 [1] : vector<8x8xf32> to vector<8xf32>
    %87 = vector.shape_cast %86 : vector<8xf32> to vector<8x1xf32>
    %88 = tpu.reciprocal %87 {approx = true} : vector<8x1xf32> -> vector<8x1xf32>
    %89 = arith.mulf %87, %88 : vector<8x1xf32>
    %cst_39 = arith.constant 2.000000e+00 : f32
    %90 = vector.broadcast %cst_39 : f32 to vector<8x1xf32>
    %91 = arith.subf %90, %89 : vector<8x1xf32>
    %92 = arith.mulf %88, %91 : vector<8x1xf32>
    %cst_40 = arith.constant dense<0.000000e+00> : vector<8x8xf32>
    %93 = tpu.matmul %85, %79, %cst_40 {dimension_numbers = #tpu.dot_dimension_numbers<[1], [0], [0], [1], [0, 0, 1, 1], [], []>} : vector<8x8xf32>, vector<8x8xf32>, vector<8x8xf32> -> vector<8x8xf32>
    %94 = vector.broadcast %92 : vector<8x1xf32> to vector<8x8xf32>
    %95 = arith.mulf %93, %94 : vector<8x8xf32>
    %c0_41 = arith.constant 0 : index
    %c16_42 = arith.constant 16 : index
    %96 = vector.load %arg17[%c0_41, %c16_42] : memref<8x32xf32, #tpu.memory_space<vmem>>, vector<8x8xf32>
    tpu.vector_store %arg17[%c0_41, %c16_42], %95 {strides = array<i32>} : memref<8x32xf32, #tpu.memory_space<vmem>>, vector<8x8xf32>,
    %97 = vector.extract_strided_slice %36 {offsets = [0, 24], sizes = [8, 8], strides = [1, 1]} : vector<8x32xf32> to vector<8x8xf32>
    %c0_43 = arith.constant 0 : index
    %c24 = arith.constant 24 : index
    %98 = vector.load %arg16[%c0_43, %c24] : memref<8x64xf32, #tpu.memory_space<vmem>>, vector<8x8xf32>
    %c0_44 = arith.constant 0 : index
    %c56 = arith.constant 56 : index
    %99 = vector.load %arg16[%c0_44, %c56] : memref<8x64xf32, #tpu.memory_space<vmem>>, vector<8x8xf32>
    %cst_45 = arith.constant dense<0.000000e+00> : vector<8x8xf32>
    %100 = tpu.matmul %97, %98, %cst_45 {dimension_numbers = #tpu.dot_dimension_numbers<[1], [1], [0], [0], [0, 0, 1, 0], [], []>} : vector<8x8xf32>, vector<8x8xf32>, vector<8x8xf32> -> vector<8x8xf32>
    %cst_46 = arith.constant dense<0xFF800000> : vector<8xf32>
    %101 = vector.multi_reduction <maximumf>, %100, %cst_46 [1] : vector<8x8xf32> to vector<8xf32>
    %102 = vector.shape_cast %101 : vector<8xf32> to vector<8x1xf32>
    %103 = vector.broadcast %102 : vector<8x1xf32> to vector<8x8xf32>
    %104 = arith.subf %100, %103 : vector<8x8xf32>
    %105 = math.exp %104 : vector<8x8xf32>
    %cst_47 = arith.constant dense<0.000000e+00> : vector<8xf32>
    %106 = vector.multi_reduction <add>, %105, %cst_47 [1] : vector<8x8xf32> to vector<8xf32>
    %107 = vector.shape_cast %106 : vector<8xf32> to vector<8x1xf32>
    %108 = tpu.reciprocal %107 {approx = true} : vector<8x1xf32> -> vector<8x1xf32>
    %109 = arith.mulf %107, %108 : vector<8x1xf32>
    %cst_48 = arith.constant 2.000000e+00 : f32
    %110 = vector.broadcast %cst_48 : f32 to vector<8x1xf32>
    %111 = arith.subf %110, %109 : vector<8x1xf32>
    %112 = arith.mulf %108, %111 : vector<8x1xf32>
    %cst_49 = arith.constant dense<0.000000e+00> : vector<8x8xf32>
    %113 = tpu.matmul %105, %99, %cst_49 {dimension_numbers = #tpu.dot_dimension_numbers<[1], [0], [0], [1], [0, 0, 1, 1], [], []>} : vector<8x8xf32>, vector<8x8xf32>, vector<8x8xf32> -> vector<8x8xf32>
    %114 = vector.broadcast %112 : vector<8x1xf32> to vector<8x8xf32>
    %115 = arith.mulf %113, %114 : vector<8x8xf32>
    %c0_50 = arith.constant 0 : index
    %c24_51 = arith.constant 24 : index
    %116 = vector.load %arg17[%c0_50, %c24_51] : memref<8x32xf32, #tpu.memory_space<vmem>>, vector<8x8xf32>
    tpu.vector_store %arg17[%c0_50, %c24_51], %115 {strides = array<i32>} : memref<8x32xf32, #tpu.memory_space<vmem>>, vector<8x8xf32>,
    %c0_52 = arith.constant 0 : index
    %c0_53 = arith.constant 0 : index
    %117 = vector.load %arg17[%c0_52, %c0_53] : memref<8x32xf32, #tpu.memory_space<vmem>>, vector<8x32xf32>
    %c0_54 = arith.constant 0 : index
    %c0_55 = arith.constant 0 : index
    %118 = vector.load %arg8[%c0_54, %c0_55] : memref<32x32xf32, #tpu.memory_space<vmem>>, vector<32x32xf32>
    %cst_56 = arith.constant dense<0.000000e+00> : vector<8x32xf32>
    %119 = tpu.matmul %117, %118, %cst_56 {dimension_numbers = #tpu.dot_dimension_numbers<[1], [0], [0], [1], [0, 0, 1, 1], [], []>} : vector<8x32xf32>, vector<32x32xf32>, vector<8x32xf32> -> vector<8x32xf32>
    %c0_57 = arith.constant 0 : index
    %c0_58 = arith.constant 0 : index
    %120 = vector.load %arg9[%c0_57, %c0_58] : memref<1x32xf32, #tpu.memory_space<vmem>>, vector<1x32xf32>
    %121 = vector.broadcast %120 : vector<1x32xf32> to vector<8x32xf32>
    %122 = arith.addf %119, %121 : vector<8x32xf32>
    %123 = arith.addf %122, %7 : vector<8x32xf32>
    %cst_59 = arith.constant dense<0.000000e+00> : vector<8xf32>
    %124 = vector.multi_reduction <add>, %123, %cst_59 [1] : vector<8x32xf32> to vector<8xf32>
    %125 = vector.shape_cast %124 : vector<8xf32> to vector<8x1xf32>
    %cst_60 = arith.constant 3.200000e+01 : f32
    %126 = vector.broadcast %cst_60 : f32 to vector<8x1xf32>
    %127 = arith.divf %125, %126 : vector<8x1xf32>
    %128 = vector.broadcast %127 : vector<8x1xf32> to vector<8x32xf32>
    %129 = arith.subf %123, %128 : vector<8x32xf32>
    %130 = arith.mulf %129, %129 : vector<8x32xf32>
    %cst_61 = arith.constant dense<0.000000e+00> : vector<8xf32>
    %131 = vector.multi_reduction <add>, %130, %cst_61 [1] : vector<8x32xf32> to vector<8xf32>
    %132 = vector.shape_cast %131 : vector<8xf32> to vector<8x1xf32>
    %cst_62 = arith.constant 3.200000e+01 : f32
    %133 = vector.broadcast %cst_62 : f32 to vector<8x1xf32>
    %134 = arith.divf %132, %133 : vector<8x1xf32>
    %cst_63 = arith.constant 9.99999974E-6 : f32
    %135 = vector.broadcast %cst_63 : f32 to vector<8x1xf32>
    %136 = arith.addf %134, %135 : vector<8x1xf32>
    %137 = math.rsqrt %136 : vector<8x1xf32>
    %138 = vector.broadcast %137 : vector<8x1xf32> to vector<8x32xf32>
    %139 = arith.mulf %129, %138 : vector<8x32xf32>
    %c0_64 = arith.constant 0 : index
    %c0_65 = arith.constant 0 : index
    %140 = vector.load %arg10[%c0_64, %c0_65] : memref<2x32xf32, #tpu.memory_space<vmem>>, vector<1x32xf32>
    %141 = vector.broadcast %140 : vector<1x32xf32> to vector<8x32xf32>
    %142 = arith.mulf %139, %141 : vector<8x32xf32>
    %c1_66 = arith.constant 1 : index
    %c0_67 = arith.constant 0 : index
    %143 = vector.load %arg10[%c1_66, %c0_67] : memref<2x32xf32, #tpu.memory_space<vmem>>, vector<1x32xf32>
    %144 = vector.broadcast %143 : vector<1x32xf32> to vector<8x32xf32>
    %145 = arith.addf %142, %144 : vector<8x32xf32>
    %c0_68 = arith.constant 0 : index
    %c0_69 = arith.constant 0 : index
    %146 = vector.load %arg11[%c0_68, %c0_69] : memref<32x64xf32, #tpu.memory_space<vmem>>, vector<32x64xf32>
    %cst_70 = arith.constant dense<0.000000e+00> : vector<8x64xf32>
    %147 = tpu.matmul %145, %146, %cst_70 {dimension_numbers = #tpu.dot_dimension_numbers<[1], [0], [0], [1], [0, 0, 1, 1], [], []>} : vector<8x32xf32>, vector<32x64xf32>, vector<8x64xf32> -> vector<8x64xf32>
    %c0_71 = arith.constant 0 : index
    %c0_72 = arith.constant 0 : index
    %148 = vector.load %arg12[%c0_71, %c0_72] : memref<1x64xf32, #tpu.memory_space<vmem>>, vector<1x64xf32>
    %149 = vector.broadcast %148 : vector<1x64xf32> to vector<8x64xf32>
    %150 = arith.addf %147, %149 : vector<8x64xf32>
    %cst_73 = arith.constant 5.000000e-01 : f32
    %151 = vector.broadcast %cst_73 : f32 to vector<8x64xf32>
    %152 = arith.mulf %151, %150 : vector<8x64xf32>
    %cst_74 = arith.constant 0.707106769 : f32
    %153 = vector.broadcast %cst_74 : f32 to vector<8x64xf32>
    %154 = arith.mulf %150, %153 : vector<8x64xf32>
    %155 = math.absf %154 : vector<8x64xf32>
    %cst_75 = arith.constant 0.327591091 : f32
    %156 = vector.broadcast %cst_75 : f32 to vector<8x64xf32>
    %157 = arith.mulf %156, %155 : vector<8x64xf32>
    %cst_76 = arith.constant 1.000000e+00 : f32
    %158 = vector.broadcast %cst_76 : f32 to vector<8x64xf32>
    %159 = arith.addf %158, %157 : vector<8x64xf32>
    %cst_77 = arith.constant 1.000000e+00 : f32
    %160 = vector.broadcast %cst_77 : f32 to vector<8x64xf32>
    %161 = arith.divf %160, %159 : vector<8x64xf32>
    %cst_78 = arith.constant 1.06140542 : f32
    %162 = vector.broadcast %cst_78 : f32 to vector<8x64xf32>
    %163 = arith.mulf %161, %162 : vector<8x64xf32>
    %cst_79 = arith.constant -1.45315206 : f32
    %164 = vector.broadcast %cst_79 : f32 to vector<8x64xf32>
    %165 = arith.addf %164, %163 : vector<8x64xf32>
    %166 = arith.mulf %161, %165 : vector<8x64xf32>
    %cst_80 = arith.constant 1.42141378 : f32
    %167 = vector.broadcast %cst_80 : f32 to vector<8x64xf32>
    %168 = arith.addf %167, %166 : vector<8x64xf32>
    %169 = arith.mulf %161, %168 : vector<8x64xf32>
    %cst_81 = arith.constant -0.284496725 : f32
    %170 = vector.broadcast %cst_81 : f32 to vector<8x64xf32>
    %171 = arith.addf %170, %169 : vector<8x64xf32>
    %172 = arith.mulf %161, %171 : vector<8x64xf32>
    %cst_82 = arith.constant 0.254829586 : f32
    %173 = vector.broadcast %cst_82 : f32 to vector<8x64xf32>
    %174 = arith.addf %173, %172 : vector<8x64xf32>
    %175 = arith.mulf %161, %174 : vector<8x64xf32>
    %cst_83 = arith.constant 0.000000e+00 : f32
    %176 = vector.broadcast %cst_83 : f32 to vector<8x64xf32>
    %177 = arith.subf %176, %155 : vector<8x64xf32>
    %178 = arith.mulf %177, %155 : vector<8x64xf32>
    %179 = math.exp %178 : vector<8x64xf32>
    %180 = arith.mulf %175, %179 : vector<8x64xf32>
    %cst_84 = arith.constant 1.000000e+00 : f32
    %181 = vector.broadcast %cst_84 : f32 to vector<8x64xf32>
    %182 = arith.subf %181, %180 : vector<8x64xf32>
    %cst_85 = arith.constant 0.000000e+00 : f32
    %183 = vector.broadcast %cst_85 : f32 to vector<8x64xf32>
    %184 = arith.cmpf olt, %154, %183 : vector<8x64xf32>
    %cst_86 = arith.constant 0.000000e+00 : f32
    %185 = vector.broadcast %cst_86 : f32 to vector<8x64xf32>
    %186 = arith.subf %185, %182 : vector<8x64xf32>
    %187 = arith.select %184, %186, %182 : vector<8x64xi1>, vector<8x64xf32>
    %cst_87 = arith.constant 1.000000e+00 : f32
    %188 = vector.broadcast %cst_87 : f32 to vector<8x64xf32>
    %189 = arith.addf %188, %187 : vector<8x64xf32>
    %190 = arith.mulf %152, %189 : vector<8x64xf32>
    %c0_88 = arith.constant 0 : index
    %c0_89 = arith.constant 0 : index
    %191 = vector.load %arg13[%c0_88, %c0_89] : memref<64x32xf32, #tpu.memory_space<vmem>>, vector<64x32xf32>
    %cst_90 = arith.constant dense<0.000000e+00> : vector<8x32xf32>
    %192 = tpu.matmul %190, %191, %cst_90 {dimension_numbers = #tpu.dot_dimension_numbers<[1], [0], [0], [1], [0, 0, 1, 1], [], []>} : vector<8x64xf32>, vector<64x32xf32>, vector<8x32xf32> -> vector<8x32xf32>
    %c0_91 = arith.constant 0 : index
    %c0_92 = arith.constant 0 : index
    %193 = vector.load %arg14[%c0_91, %c0_92] : memref<1x32xf32, #tpu.memory_space<vmem>>, vector<1x32xf32>
    %194 = vector.broadcast %193 : vector<1x32xf32> to vector<8x32xf32>
    %195 = arith.addf %192, %194 : vector<8x32xf32>
    %196 = arith.addf %195, %123 : vector<8x32xf32>
    %c0_93 = arith.constant 0 : index
    %c0_94 = arith.constant 0 : index
    %c0_95 = arith.constant 0 : index
    %197 = vector.load %arg15[%c0_93, %c0_94, %c0_95] : memref<1x8x32xf32, #tpu.memory_space<vmem>>, vector<1x8x32xf32>
    %198 = vector.shape_cast %197 : vector<1x8x32xf32> to vector<8x32xf32>
    %199 = vector.shape_cast %196 : vector<8x32xf32> to vector<1x8x32xf32>
    tpu.vector_store %arg15[%c0_93, %c0_94, %c0_95], %199 {strides = array<i32>} : memref<1x8x32xf32, #tpu.memory_space<vmem>>, vector<1x8x32xf32>,
    return
  }
  func.func @transform_0(%arg0: i32, %arg1: i32) -> (i32, i32, i32) {
    %c0_i32 = arith.constant 0 : i32
    %c0_i32_0 = arith.constant 0 : i32
    %c0_i32_1 = arith.constant 0 : i32
    return %arg0, %c0_i32, %c0_i32_0 : i32, i32, i32
  }
  func.func @transform_1(%arg0: i32, %arg1: i32) -> (i32, i32) {
    %c0_i32 = arith.constant 0 : i32
    %c0_i32_0 = arith.constant 0 : i32
    %c0_i32_1 = arith.constant 0 : i32
    return %c0_i32, %c0_i32_0 : i32, i32
  }
  func.func @transform_2(%arg0: i32, %arg1: i32) -> (i32, i32) {
    %c0_i32 = arith.constant 0 : i32
    %c0_i32_0 = arith.constant 0 : i32
    %c0_i32_1 = arith.constant 0 : i32
    return %c0_i32, %c0_i32_0 : i32, i32
  }
  func.func @transform_3(%arg0: i32, %arg1: i32) -> (i32, i32) {
    %c0_i32 = arith.constant 0 : i32
    %c0_i32_0 = arith.constant 0 : i32
    %c0_i32_1 = arith.constant 0 : i32
    return %c0_i32, %c0_i32_0 : i32, i32
  }
  func.func @transform_4(%arg0: i32, %arg1: i32) -> (i32, i32) {
    %c0_i32 = arith.constant 0 : i32
    %c0_i32_0 = arith.constant 0 : i32
    %c0_i32_1 = arith.constant 0 : i32
    return %c0_i32, %c0_i32_0 : i32, i32
  }
  func.func @transform_5(%arg0: i32, %arg1: i32) -> (i32, i32) {
    %c0_i32 = arith.constant 0 : i32
    %c0_i32_0 = arith.constant 0 : i32
    %c0_i32_1 = arith.constant 0 : i32
    return %c0_i32, %c0_i32_0 : i32, i32
  }
  func.func @transform_6(%arg0: i32, %arg1: i32) -> (i32, i32) {
    %c0_i32 = arith.constant 0 : i32
    %c0_i32_0 = arith.constant 0 : i32
    %c0_i32_1 = arith.constant 0 : i32
    return %c0_i32, %c0_i32_0 : i32, i32
  }
  func.func @transform_7(%arg0: i32, %arg1: i32) -> (i32, i32) {
    %c0_i32 = arith.constant 0 : i32
    %c0_i32_0 = arith.constant 0 : i32
    %c0_i32_1 = arith.constant 0 : i32
    return %c0_i32, %c0_i32_0 : i32, i32
  }
  func.func @transform_8(%arg0: i32, %arg1: i32) -> (i32, i32) {
    %c0_i32 = arith.constant 0 : i32
    %c0_i32_0 = arith.constant 0 : i32
    %c0_i32_1 = arith.constant 0 : i32
    return %c0_i32, %c0_i32_0 : i32, i32
  }
  func.func @transform_9(%arg0: i32, %arg1: i32) -> (i32, i32) {
    %c0_i32 = arith.constant 0 : i32
    %c0_i32_0 = arith.constant 0 : i32
    %c0_i32_1 = arith.constant 0 : i32
    return %c0_i32, %c0_i32_0 : i32, i32
  }
  func.func @transform_10(%arg0: i32, %arg1: i32) -> (i32, i32) {
    %c0_i32 = arith.constant 0 : i32
    %c0_i32_0 = arith.constant 0 : i32
    %c0_i32_1 = arith.constant 0 : i32
    return %c0_i32, %c0_i32_0 : i32, i32
  }
  func.func @transform_11(%arg0: i32, %arg1: i32) -> (i32, i32) {
    %c0_i32 = arith.constant 0 : i32
    %c0_i32_0 = arith.constant 0 : i32
    %c0_i32_1 = arith.constant 0 : i32
    return %c0_i32, %c0_i32_0 : i32, i32
  }
  func.func @transform_12(%arg0: i32, %arg1: i32) -> (i32, i32) {
    %c0_i32 = arith.constant 0 : i32
    %c0_i32_0 = arith.constant 0 : i32
    %c0_i32_1 = arith.constant 0 : i32
    return %c0_i32, %c0_i32_0 : i32, i32
  }
  func.func @transform_13(%arg0: i32, %arg1: i32) -> (i32, i32, i32) {
    %c0_i32 = arith.constant 0 : i32
    %c0_i32_0 = arith.constant 0 : i32
    return %arg0, %arg1, %c0_i32 : i32, i32, i32
  }
}

module attributes {stable_mosaic.version = 11 : i64} {
  func.func @encoder_block_kernel(%arg0: i32, %arg1: i32, %arg2: memref<1x8x32xf32, #tpu.memory_space<vmem>>, %arg3: memref<2x32xf32, #tpu.memory_space<vmem>>, %arg4: memref<32x32xf32, #tpu.memory_space<vmem>>, %arg5: memref<1x32xf32, #tpu.memory_space<vmem>>, %arg6: memref<32x64xf32, #tpu.memory_space<vmem>>, %arg7: memref<1x64xf32, #tpu.memory_space<vmem>>, %arg8: memref<32x32xf32, #tpu.memory_space<vmem>>, %arg9: memref<1x32xf32, #tpu.memory_space<vmem>>, %arg10: memref<2x32xf32, #tpu.memory_space<vmem>>, %arg11: memref<32x64xf32, #tpu.memory_space<vmem>>, %arg12: memref<1x64xf32, #tpu.memory_space<vmem>>, %arg13: memref<64x32xf32, #tpu.memory_space<vmem>>, %arg14: memref<1x32xf32, #tpu.memory_space<vmem>>, %arg15: memref<1x8x32xf32, #tpu.memory_space<vmem>>, %arg16: memref<8x64xf32, #tpu.memory_space<vmem>>, %arg17: memref<8x32xf32, #tpu.memory_space<vmem>>) attributes {dimension_semantics = [#tpu.dimension_semantics<parallel>, #tpu.dimension_semantics<arbitrary>], iteration_bounds = array<i64: 2, 1>, scalar_prefetch = 0 : i64, scratch_operands = 2 : i64, tpu.core_type = #tpu.core_type<tc>, window_params = [{transform_indices = @transform_0, window_bounds = array<i64: 1, 8, 32>}, {pipeline_mode = #tpu.pipeline_mode<synchronous>, transform_indices = @transform_1, window_bounds = array<i64: 2, 32>}, {pipeline_mode = #tpu.pipeline_mode<synchronous>, transform_indices = @transform_2, window_bounds = array<i64: 32, 32>}, {pipeline_mode = #tpu.pipeline_mode<synchronous>, transform_indices = @transform_3, window_bounds = array<i64: 1, 32>}, {pipeline_mode = #tpu.pipeline_mode<synchronous>, transform_indices = @transform_4, window_bounds = array<i64: 32, 64>}, {pipeline_mode = #tpu.pipeline_mode<synchronous>, transform_indices = @transform_5, window_bounds = array<i64: 1, 64>}, {pipeline_mode = #tpu.pipeline_mode<synchronous>, transform_indices = @transform_6, window_bounds = array<i64: 32, 32>}, {pipeline_mode = #tpu.pipeline_mode<synchronous>, transform_indices = @transform_7, window_bounds = array<i64: 1, 32>}, {pipeline_mode = #tpu.pipeline_mode<synchronous>, transform_indices = @transform_8, window_bounds = array<i64: 2, 32>}, {pipeline_mode = #tpu.pipeline_mode<synchronous>, transform_indices = @transform_9, window_bounds = array<i64: 32, 64>}, {pipeline_mode = #tpu.pipeline_mode<synchronous>, transform_indices = @transform_10, window_bounds = array<i64: 1, 64>}, {pipeline_mode = #tpu.pipeline_mode<synchronous>, transform_indices = @transform_11, window_bounds = array<i64: 64, 32>}, {pipeline_mode = #tpu.pipeline_mode<synchronous>, transform_indices = @transform_12, window_bounds = array<i64: 1, 32>}, {transform_indices = @transform_13, window_bounds = array<i64: 1, 8, 32>}]} {
    %c0_i32 = arith.constant 0 : i32
    %0 = arith.cmpi eq, %arg1, %c0_i32 : i32
    %1 = arith.extui %0 : i1 to i32
    %c0_i32_0 = arith.constant 0 : i32
    %2 = arith.cmpi ne, %1, %c0_i32_0 : i32
    scf.if %2 {
      %c0_96 = arith.constant 0 : index
      %c0_97 = arith.constant 0 : index
      %c0_98 = arith.constant 0 : index
      %200 = vector.load %arg2[%c0_96, %c0_97, %c0_98] : memref<1x8x32xf32, #tpu.memory_space<vmem>>, vector<1x8x32xf32>
      %201 = vector.shape_cast %200 : vector<1x8x32xf32> to vector<8x32xf32>
      %cst_99 = arith.constant dense<0.000000e+00> : vector<8xf32>
      %202 = vector.multi_reduction <add>, %201, %cst_99 [1] : vector<8x32xf32> to vector<8xf32>
      %203 = vector.shape_cast %202 : vector<8xf32> to vector<8x1xf32>
      %cst_100 = arith.constant 3.200000e+01 : f32
      %204 = vector.broadcast %cst_100 : f32 to vector<8x1xf32>
      %205 = arith.divf %203, %204 : vector<8x1xf32>
      %206 = vector.broadcast %205 : vector<8x1xf32> to vector<8x32xf32>
      %207 = arith.subf %201, %206 : vector<8x32xf32>
      %208 = arith.mulf %207, %207 : vector<8x32xf32>
      %cst_101 = arith.constant dense<0.000000e+00> : vector<8xf32>
      %209 = vector.multi_reduction <add>, %208, %cst_101 [1] : vector<8x32xf32> to vector<8xf32>
      %210 = vector.shape_cast %209 : vector<8xf32> to vector<8x1xf32>
      %cst_102 = arith.constant 3.200000e+01 : f32
      %211 = vector.broadcast %cst_102 : f32 to vector<8x1xf32>
      %212 = arith.divf %210, %211 : vector<8x1xf32>
      %cst_103 = arith.constant 9.99999974E-6 : f32
      %213 = vector.broadcast %cst_103 : f32 to vector<8x1xf32>
      %214 = arith.addf %212, %213 : vector<8x1xf32>
      %215 = math.rsqrt %214 : vector<8x1xf32>
      %216 = vector.broadcast %215 : vector<8x1xf32> to vector<8x32xf32>
      %217 = arith.mulf %207, %216 : vector<8x32xf32>
      %c0_104 = arith.constant 0 : index
      %c0_105 = arith.constant 0 : index
      %218 = vector.load %arg3[%c0_104, %c0_105] : memref<2x32xf32, #tpu.memory_space<vmem>>, vector<1x32xf32>
      %219 = vector.broadcast %218 : vector<1x32xf32> to vector<8x32xf32>
      %220 = arith.mulf %217, %219 : vector<8x32xf32>
      %c1_106 = arith.constant 1 : index
      %c0_107 = arith.constant 0 : index
      %221 = vector.load %arg3[%c1_106, %c0_107] : memref<2x32xf32, #tpu.memory_space<vmem>>, vector<1x32xf32>
      %222 = vector.broadcast %221 : vector<1x32xf32> to vector<8x32xf32>
      %223 = arith.addf %220, %222 : vector<8x32xf32>
      %c0_108 = arith.constant 0 : index
      %c0_109 = arith.constant 0 : index
      %224 = vector.load %arg6[%c0_108, %c0_109] : memref<32x64xf32, #tpu.memory_space<vmem>>, vector<32x64xf32>
      %cst_110 = arith.constant dense<0.000000e+00> : vector<8x64xf32>
      %225 = tpu.matmul %223, %224, %cst_110 {dimension_numbers = #tpu.dot_dimension_numbers<[1], [0], [0], [1], [0, 0, 1, 1], [], []>} : vector<8x32xf32>, vector<32x64xf32>, vector<8x64xf32> -> vector<8x64xf32>
      %c0_111 = arith.constant 0 : index
      %c0_112 = arith.constant 0 : index
      %226 = vector.load %arg7[%c0_111, %c0_112] : memref<1x64xf32, #tpu.memory_space<vmem>>, vector<1x64xf32>
      %227 = vector.broadcast %226 : vector<1x64xf32> to vector<8x64xf32>
      %228 = arith.addf %225, %227 : vector<8x64xf32>
      %c0_113 = arith.constant 0 : index
      %c0_114 = arith.constant 0 : index
      %229 = vector.load %arg16[%c0_113, %c0_114] : memref<8x64xf32, #tpu.memory_space<vmem>>, vector<8x64xf32>
      tpu.vector_store %arg16[%c0_113, %c0_114], %228 {strides = array<i32>} : memref<8x64xf32, #tpu.memory_space<vmem>>, vector<8x64xf32>,
    } else {
    }
    %c8_i32 = arith.constant 8 : i32
    %3 = arith.muli %arg1, %c8_i32 : i32
    %4 = tpu.assume_multiple %3, 8 : i32
    %c0 = arith.constant 0 : index
    %5 = arith.index_cast %4 : i32 to index
    %c0_1 = arith.constant 0 : index
    %6 = vector.load %arg2[%c0, %5, %c0_1] : memref<1x8x32xf32, #tpu.memory_space<vmem>>, vector<1x8x32xf32>
    %7 = vector.shape_cast %6 : vector<1x8x32xf32> to vector<8x32xf32>
    %cst = arith.constant dense<0.000000e+00> : vector<8xf32>
    %8 = vector.multi_reduction <add>, %7, %cst [1] : vector<8x32xf32> to vector<8xf32>
    %9 = vector.shape_cast %8 : vector<8xf32> to vector<8x1xf32>
    %cst_2 = arith.constant 3.200000e+01 : f32
    %10 = vector.broadcast %cst_2 : f32 to vector<8x1xf32>
    %11 = arith.divf %9, %10 : vector<8x1xf32>
    %12 = vector.broadcast %11 : vector<8x1xf32> to vector<8x32xf32>
    %13 = arith.subf %7, %12 : vector<8x32xf32>
    %14 = arith.mulf %13, %13 : vector<8x32xf32>
    %cst_3 = arith.constant dense<0.000000e+00> : vector<8xf32>
    %15 = vector.multi_reduction <add>, %14, %cst_3 [1] : vector<8x32xf32> to vector<8xf32>
    %16 = vector.shape_cast %15 : vector<8xf32> to vector<8x1xf32>
    %cst_4 = arith.constant 3.200000e+01 : f32
    %17 = vector.broadcast %cst_4 : f32 to vector<8x1xf32>
    %18 = arith.divf %16, %17 : vector<8x1xf32>
    %cst_5 = arith.constant 9.99999974E-6 : f32
    %19 = vector.broadcast %cst_5 : f32 to vector<8x1xf32>
    %20 = arith.addf %18, %19 : vector<8x1xf32>
    %21 = math.rsqrt %20 : vector<8x1xf32>
    %22 = vector.broadcast %21 : vector<8x1xf32> to vector<8x32xf32>
    %23 = arith.mulf %13, %22 : vector<8x32xf32>
    %c0_6 = arith.constant 0 : index
    %c0_7 = arith.constant 0 : index
    %24 = vector.load %arg3[%c0_6, %c0_7] : memref<2x32xf32, #tpu.memory_space<vmem>>, vector<1x32xf32>
    %25 = vector.broadcast %24 : vector<1x32xf32> to vector<8x32xf32>
    %26 = arith.mulf %23, %25 : vector<8x32xf32>
    %c1 = arith.constant 1 : index
    %c0_8 = arith.constant 0 : index
    %27 = vector.load %arg3[%c1, %c0_8] : memref<2x32xf32, #tpu.memory_space<vmem>>, vector<1x32xf32>
    %28 = vector.broadcast %27 : vector<1x32xf32> to vector<8x32xf32>
    %29 = arith.addf %26, %28 : vector<8x32xf32>
    %c0_9 = arith.constant 0 : index
    %c0_10 = arith.constant 0 : index
    %30 = vector.load %arg4[%c0_9, %c0_10] : memref<32x32xf32, #tpu.memory_space<vmem>>, vector<32x32xf32>
    %cst_11 = arith.constant dense<0.000000e+00> : vector<8x32xf32>
    %31 = tpu.matmul %29, %30, %cst_11 {dimension_numbers = #tpu.dot_dimension_numbers<[1], [0], [0], [1], [0, 0, 1, 1], [], []>} : vector<8x32xf32>, vector<32x32xf32>, vector<8x32xf32> -> vector<8x32xf32>
    %c0_12 = arith.constant 0 : index
    %c0_13 = arith.constant 0 : index
    %32 = vector.load %arg5[%c0_12, %c0_13] : memref<1x32xf32, #tpu.memory_space<vmem>>, vector<1x32xf32>
    %33 = vector.broadcast %32 : vector<1x32xf32> to vector<8x32xf32>
    %34 = arith.addf %31, %33 : vector<8x32xf32>
    %cst_14 = arith.constant 0.353553385 : f32
    %35 = vector.broadcast %cst_14 : f32 to vector<8x32xf32>
    %36 = arith.mulf %34, %35 : vector<8x32xf32>
    %37 = vector.extract_strided_slice %36 {offsets = [0, 0], sizes = [8, 8], strides = [1, 1]} : vector<8x32xf32> to vector<8x8xf32>
    %c0_15 = arith.constant 0 : index
    %c0_16 = arith.constant 0 : index
    %38 = vector.load %arg16[%c0_15, %c0_16] : memref<8x64xf32, #tpu.memory_space<vmem>>, vector<8x8xf32>
    %c0_17 = arith.constant 0 : index
    %c32 = arith.constant 32 : index
    %39 = vector.load %arg16[%c0_17, %c32] : memref<8x64xf32, #tpu.memory_space<vmem>>, vector<8x8xf32>
    %cst_18 = arith.constant dense<0.000000e+00> : vector<8x8xf32>
    %40 = tpu.matmul %37, %38, %cst_18 {dimension_numbers = #tpu.dot_dimension_numbers<[1], [1], [0], [0], [0, 0, 1, 0], [], []>} : vector<8x8xf32>, vector<8x8xf32>, vector<8x8xf32> -> vector<8x8xf32>
    %cst_19 = arith.constant dense<0xFF800000> : vector<8xf32>
    %41 = vector.multi_reduction <maximumf>, %40, %cst_19 [1] : vector<8x8xf32> to vector<8xf32>
    %42 = vector.shape_cast %41 : vector<8xf32> to vector<8x1xf32>
    %43 = vector.broadcast %42 : vector<8x1xf32> to vector<8x8xf32>
    %44 = arith.subf %40, %43 : vector<8x8xf32>
    %45 = math.exp %44 : vector<8x8xf32>
    %cst_20 = arith.constant dense<0.000000e+00> : vector<8xf32>
    %46 = vector.multi_reduction <add>, %45, %cst_20 [1] : vector<8x8xf32> to vector<8xf32>
    %47 = vector.shape_cast %46 : vector<8xf32> to vector<8x1xf32>
    %48 = tpu.reciprocal %47 {approx = true} : vector<8x1xf32> -> vector<8x1xf32>
    %49 = arith.mulf %47, %48 : vector<8x1xf32>
    %cst_21 = arith.constant 2.000000e+00 : f32
    %50 = vector.broadcast %cst_21 : f32 to vector<8x1xf32>
    %51 = arith.subf %50, %49 : vector<8x1xf32>
    %52 = arith.mulf %48, %51 : vector<8x1xf32>
    %cst_22 = arith.constant dense<0.000000e+00> : vector<8x8xf32>
    %53 = tpu.matmul %45, %39, %cst_22 {dimension_numbers = #tpu.dot_dimension_numbers<[1], [0], [0], [1], [0, 0, 1, 1], [], []>} : vector<8x8xf32>, vector<8x8xf32>, vector<8x8xf32> -> vector<8x8xf32>
    %54 = vector.broadcast %52 : vector<8x1xf32> to vector<8x8xf32>
    %55 = arith.mulf %53, %54 : vector<8x8xf32>
    %c0_23 = arith.constant 0 : index
    %c0_24 = arith.constant 0 : index
    %56 = vector.load %arg17[%c0_23, %c0_24] : memref<8x32xf32, #tpu.memory_space<vmem>>, vector<8x8xf32>
    tpu.vector_store %arg17[%c0_23, %c0_24], %55 {strides = array<i32>} : memref<8x32xf32, #tpu.memory_space<vmem>>, vector<8x8xf32>,
    %57 = vector.extract_strided_slice %36 {offsets = [0, 8], sizes = [8, 8], strides = [1, 1]} : vector<8x32xf32> to vector<8x8xf32>
    %c0_25 = arith.constant 0 : index
    %c8 = arith.constant 8 : index
    %58 = vector.load %arg16[%c0_25, %c8] : memref<8x64xf32, #tpu.memory_space<vmem>>, vector<8x8xf32>
    %c0_26 = arith.constant 0 : index
    %c40 = arith.constant 40 : index
    %59 = vector.load %arg16[%c0_26, %c40] : memref<8x64xf32, #tpu.memory_space<vmem>>, vector<8x8xf32>
    %cst_27 = arith.constant dense<0.000000e+00> : vector<8x8xf32>
    %60 = tpu.matmul %57, %58, %cst_27 {dimension_numbers = #tpu.dot_dimension_numbers<[1], [1], [0], [0], [0, 0, 1, 0], [], []>} : vector<8x8xf32>, vector<8x8xf32>, vector<8x8xf32> -> vector<8x8xf32>
    %cst_28 = arith.constant dense<0xFF800000> : vector<8xf32>
    %61 = vector.multi_reduction <maximumf>, %60, %cst_28 [1] : vector<8x8xf32> to vector<8xf32>
    %62 = vector.shape_cast %61 : vector<8xf32> to vector<8x1xf32>
    %63 = vector.broadcast %62 : vector<8x1xf32> to vector<8x8xf32>
    %64 = arith.subf %60, %63 : vector<8x8xf32>
    %65 = math.exp %64 : vector<8x8xf32>
    %cst_29 = arith.constant dense<0.000000e+00> : vector<8xf32>
    %66 = vector.multi_reduction <add>, %65, %cst_29 [1] : vector<8x8xf32> to vector<8xf32>
    %67 = vector.shape_cast %66 : vector<8xf32> to vector<8x1xf32>
    %68 = tpu.reciprocal %67 {approx = true} : vector<8x1xf32> -> vector<8x1xf32>
    %69 = arith.mulf %67, %68 : vector<8x1xf32>
    %cst_30 = arith.constant 2.000000e+00 : f32
    %70 = vector.broadcast %cst_30 : f32 to vector<8x1xf32>
    %71 = arith.subf %70, %69 : vector<8x1xf32>
    %72 = arith.mulf %68, %71 : vector<8x1xf32>
    %cst_31 = arith.constant dense<0.000000e+00> : vector<8x8xf32>
    %73 = tpu.matmul %65, %59, %cst_31 {dimension_numbers = #tpu.dot_dimension_numbers<[1], [0], [0], [1], [0, 0, 1, 1], [], []>} : vector<8x8xf32>, vector<8x8xf32>, vector<8x8xf32> -> vector<8x8xf32>
    %74 = vector.broadcast %72 : vector<8x1xf32> to vector<8x8xf32>
    %75 = arith.mulf %73, %74 : vector<8x8xf32>
    %c0_32 = arith.constant 0 : index
    %c8_33 = arith.constant 8 : index
    %76 = vector.load %arg17[%c0_32, %c8_33] : memref<8x32xf32, #tpu.memory_space<vmem>>, vector<8x8xf32>
    tpu.vector_store %arg17[%c0_32, %c8_33], %75 {strides = array<i32>} : memref<8x32xf32, #tpu.memory_space<vmem>>, vector<8x8xf32>,
    %77 = vector.extract_strided_slice %36 {offsets = [0, 16], sizes = [8, 8], strides = [1, 1]} : vector<8x32xf32> to vector<8x8xf32>
    %c0_34 = arith.constant 0 : index
    %c16 = arith.constant 16 : index
    %78 = vector.load %arg16[%c0_34, %c16] : memref<8x64xf32, #tpu.memory_space<vmem>>, vector<8x8xf32>
    %c0_35 = arith.constant 0 : index
    %c48 = arith.constant 48 : index
    %79 = vector.load %arg16[%c0_35, %c48] : memref<8x64xf32, #tpu.memory_space<vmem>>, vector<8x8xf32>
    %cst_36 = arith.constant dense<0.000000e+00> : vector<8x8xf32>
    %80 = tpu.matmul %77, %78, %cst_36 {dimension_numbers = #tpu.dot_dimension_numbers<[1], [1], [0], [0], [0, 0, 1, 0], [], []>} : vector<8x8xf32>, vector<8x8xf32>, vector<8x8xf32> -> vector<8x8xf32>
    %cst_37 = arith.constant dense<0xFF800000> : vector<8xf32>
    %81 = vector.multi_reduction <maximumf>, %80, %cst_37 [1] : vector<8x8xf32> to vector<8xf32>
    %82 = vector.shape_cast %81 : vector<8xf32> to vector<8x1xf32>
    %83 = vector.broadcast %82 : vector<8x1xf32> to vector<8x8xf32>
    %84 = arith.subf %80, %83 : vector<8x8xf32>
    %85 = math.exp %84 : vector<8x8xf32>
    %cst_38 = arith.constant dense<0.000000e+00> : vector<8xf32>
    %86 = vector.multi_reduction <add>, %85, %cst_38 [1] : vector<8x8xf32> to vector<8xf32>
    %87 = vector.shape_cast %86 : vector<8xf32> to vector<8x1xf32>
    %88 = tpu.reciprocal %87 {approx = true} : vector<8x1xf32> -> vector<8x1xf32>
    %89 = arith.mulf %87, %88 : vector<8x1xf32>
    %cst_39 = arith.constant 2.000000e+00 : f32
    %90 = vector.broadcast %cst_39 : f32 to vector<8x1xf32>
    %91 = arith.subf %90, %89 : vector<8x1xf32>
    %92 = arith.mulf %88, %91 : vector<8x1xf32>
    %cst_40 = arith.constant dense<0.000000e+00> : vector<8x8xf32>
    %93 = tpu.matmul %85, %79, %cst_40 {dimension_numbers = #tpu.dot_dimension_numbers<[1], [0], [0], [1], [0, 0, 1, 1], [], []>} : vector<8x8xf32>, vector<8x8xf32>, vector<8x8xf32> -> vector<8x8xf32>
    %94 = vector.broadcast %92 : vector<8x1xf32> to vector<8x8xf32>
    %95 = arith.mulf %93, %94 : vector<8x8xf32>
    %c0_41 = arith.constant 0 : index
    %c16_42 = arith.constant 16 : index
    %96 = vector.load %arg17[%c0_41, %c16_42] : memref<8x32xf32, #tpu.memory_space<vmem>>, vector<8x8xf32>
    tpu.vector_store %arg17[%c0_41, %c16_42], %95 {strides = array<i32>} : memref<8x32xf32, #tpu.memory_space<vmem>>, vector<8x8xf32>,
    %97 = vector.extract_strided_slice %36 {offsets = [0, 24], sizes = [8, 8], strides = [1, 1]} : vector<8x32xf32> to vector<8x8xf32>
    %c0_43 = arith.constant 0 : index
    %c24 = arith.constant 24 : index
    %98 = vector.load %arg16[%c0_43, %c24] : memref<8x64xf32, #tpu.memory_space<vmem>>, vector<8x8xf32>
    %c0_44 = arith.constant 0 : index
    %c56 = arith.constant 56 : index
    %99 = vector.load %arg16[%c0_44, %c56] : memref<8x64xf32, #tpu.memory_space<vmem>>, vector<8x8xf32>
    %cst_45 = arith.constant dense<0.000000e+00> : vector<8x8xf32>
    %100 = tpu.matmul %97, %98, %cst_45 {dimension_numbers = #tpu.dot_dimension_numbers<[1], [1], [0], [0], [0, 0, 1, 0], [], []>} : vector<8x8xf32>, vector<8x8xf32>, vector<8x8xf32> -> vector<8x8xf32>
    %cst_46 = arith.constant dense<0xFF800000> : vector<8xf32>
    %101 = vector.multi_reduction <maximumf>, %100, %cst_46 [1] : vector<8x8xf32> to vector<8xf32>
    %102 = vector.shape_cast %101 : vector<8xf32> to vector<8x1xf32>
    %103 = vector.broadcast %102 : vector<8x1xf32> to vector<8x8xf32>
    %104 = arith.subf %100, %103 : vector<8x8xf32>
    %105 = math.exp %104 : vector<8x8xf32>
    %cst_47 = arith.constant dense<0.000000e+00> : vector<8xf32>
    %106 = vector.multi_reduction <add>, %105, %cst_47 [1] : vector<8x8xf32> to vector<8xf32>
    %107 = vector.shape_cast %106 : vector<8xf32> to vector<8x1xf32>
    %108 = tpu.reciprocal %107 {approx = true} : vector<8x1xf32> -> vector<8x1xf32>
    %109 = arith.mulf %107, %108 : vector<8x1xf32>
    %cst_48 = arith.constant 2.000000e+00 : f32
    %110 = vector.broadcast %cst_48 : f32 to vector<8x1xf32>
    %111 = arith.subf %110, %109 : vector<8x1xf32>
    %112 = arith.mulf %108, %111 : vector<8x1xf32>
    %cst_49 = arith.constant dense<0.000000e+00> : vector<8x8xf32>
    %113 = tpu.matmul %105, %99, %cst_49 {dimension_numbers = #tpu.dot_dimension_numbers<[1], [0], [0], [1], [0, 0, 1, 1], [], []>} : vector<8x8xf32>, vector<8x8xf32>, vector<8x8xf32> -> vector<8x8xf32>
    %114 = vector.broadcast %112 : vector<8x1xf32> to vector<8x8xf32>
    %115 = arith.mulf %113, %114 : vector<8x8xf32>
    %c0_50 = arith.constant 0 : index
    %c24_51 = arith.constant 24 : index
    %116 = vector.load %arg17[%c0_50, %c24_51] : memref<8x32xf32, #tpu.memory_space<vmem>>, vector<8x8xf32>
    tpu.vector_store %arg17[%c0_50, %c24_51], %115 {strides = array<i32>} : memref<8x32xf32, #tpu.memory_space<vmem>>, vector<8x8xf32>,
    %c0_52 = arith.constant 0 : index
    %c0_53 = arith.constant 0 : index
    %117 = vector.load %arg17[%c0_52, %c0_53] : memref<8x32xf32, #tpu.memory_space<vmem>>, vector<8x32xf32>
    %c0_54 = arith.constant 0 : index
    %c0_55 = arith.constant 0 : index
    %118 = vector.load %arg8[%c0_54, %c0_55] : memref<32x32xf32, #tpu.memory_space<vmem>>, vector<32x32xf32>
    %cst_56 = arith.constant dense<0.000000e+00> : vector<8x32xf32>
    %119 = tpu.matmul %117, %118, %cst_56 {dimension_numbers = #tpu.dot_dimension_numbers<[1], [0], [0], [1], [0, 0, 1, 1], [], []>} : vector<8x32xf32>, vector<32x32xf32>, vector<8x32xf32> -> vector<8x32xf32>
    %c0_57 = arith.constant 0 : index
    %c0_58 = arith.constant 0 : index
    %120 = vector.load %arg9[%c0_57, %c0_58] : memref<1x32xf32, #tpu.memory_space<vmem>>, vector<1x32xf32>
    %121 = vector.broadcast %120 : vector<1x32xf32> to vector<8x32xf32>
    %122 = arith.addf %119, %121 : vector<8x32xf32>
    %123 = arith.addf %122, %7 : vector<8x32xf32>
    %cst_59 = arith.constant dense<0.000000e+00> : vector<8xf32>
    %124 = vector.multi_reduction <add>, %123, %cst_59 [1] : vector<8x32xf32> to vector<8xf32>
    %125 = vector.shape_cast %124 : vector<8xf32> to vector<8x1xf32>
    %cst_60 = arith.constant 3.200000e+01 : f32
    %126 = vector.broadcast %cst_60 : f32 to vector<8x1xf32>
    %127 = arith.divf %125, %126 : vector<8x1xf32>
    %128 = vector.broadcast %127 : vector<8x1xf32> to vector<8x32xf32>
    %129 = arith.subf %123, %128 : vector<8x32xf32>
    %130 = arith.mulf %129, %129 : vector<8x32xf32>
    %cst_61 = arith.constant dense<0.000000e+00> : vector<8xf32>
    %131 = vector.multi_reduction <add>, %130, %cst_61 [1] : vector<8x32xf32> to vector<8xf32>
    %132 = vector.shape_cast %131 : vector<8xf32> to vector<8x1xf32>
    %cst_62 = arith.constant 3.200000e+01 : f32
    %133 = vector.broadcast %cst_62 : f32 to vector<8x1xf32>
    %134 = arith.divf %132, %133 : vector<8x1xf32>
    %cst_63 = arith.constant 9.99999974E-6 : f32
    %135 = vector.broadcast %cst_63 : f32 to vector<8x1xf32>
    %136 = arith.addf %134, %135 : vector<8x1xf32>
    %137 = math.rsqrt %136 : vector<8x1xf32>
    %138 = vector.broadcast %137 : vector<8x1xf32> to vector<8x32xf32>
    %139 = arith.mulf %129, %138 : vector<8x32xf32>
    %c0_64 = arith.constant 0 : index
    %c0_65 = arith.constant 0 : index
    %140 = vector.load %arg10[%c0_64, %c0_65] : memref<2x32xf32, #tpu.memory_space<vmem>>, vector<1x32xf32>
    %141 = vector.broadcast %140 : vector<1x32xf32> to vector<8x32xf32>
    %142 = arith.mulf %139, %141 : vector<8x32xf32>
    %c1_66 = arith.constant 1 : index
    %c0_67 = arith.constant 0 : index
    %143 = vector.load %arg10[%c1_66, %c0_67] : memref<2x32xf32, #tpu.memory_space<vmem>>, vector<1x32xf32>
    %144 = vector.broadcast %143 : vector<1x32xf32> to vector<8x32xf32>
    %145 = arith.addf %142, %144 : vector<8x32xf32>
    %c0_68 = arith.constant 0 : index
    %c0_69 = arith.constant 0 : index
    %146 = vector.load %arg11[%c0_68, %c0_69] : memref<32x64xf32, #tpu.memory_space<vmem>>, vector<32x64xf32>
    %cst_70 = arith.constant dense<0.000000e+00> : vector<8x64xf32>
    %147 = tpu.matmul %145, %146, %cst_70 {dimension_numbers = #tpu.dot_dimension_numbers<[1], [0], [0], [1], [0, 0, 1, 1], [], []>} : vector<8x32xf32>, vector<32x64xf32>, vector<8x64xf32> -> vector<8x64xf32>
    %c0_71 = arith.constant 0 : index
    %c0_72 = arith.constant 0 : index
    %148 = vector.load %arg12[%c0_71, %c0_72] : memref<1x64xf32, #tpu.memory_space<vmem>>, vector<1x64xf32>
    %149 = vector.broadcast %148 : vector<1x64xf32> to vector<8x64xf32>
    %150 = arith.addf %147, %149 : vector<8x64xf32>
    %cst_73 = arith.constant 5.000000e-01 : f32
    %151 = vector.broadcast %cst_73 : f32 to vector<8x64xf32>
    %152 = arith.mulf %151, %150 : vector<8x64xf32>
    %cst_74 = arith.constant 0.707106769 : f32
    %153 = vector.broadcast %cst_74 : f32 to vector<8x64xf32>
    %154 = arith.mulf %150, %153 : vector<8x64xf32>
    %155 = math.absf %154 : vector<8x64xf32>
    %cst_75 = arith.constant 0.327591091 : f32
    %156 = vector.broadcast %cst_75 : f32 to vector<8x64xf32>
    %157 = arith.mulf %156, %155 : vector<8x64xf32>
    %cst_76 = arith.constant 1.000000e+00 : f32
    %158 = vector.broadcast %cst_76 : f32 to vector<8x64xf32>
    %159 = arith.addf %158, %157 : vector<8x64xf32>
    %cst_77 = arith.constant 1.000000e+00 : f32
    %160 = vector.broadcast %cst_77 : f32 to vector<8x64xf32>
    %161 = arith.divf %160, %159 : vector<8x64xf32>
    %cst_78 = arith.constant 1.06140542 : f32
    %162 = vector.broadcast %cst_78 : f32 to vector<8x64xf32>
    %163 = arith.mulf %161, %162 : vector<8x64xf32>
    %cst_79 = arith.constant -1.45315206 : f32
    %164 = vector.broadcast %cst_79 : f32 to vector<8x64xf32>
    %165 = arith.addf %164, %163 : vector<8x64xf32>
    %166 = arith.mulf %161, %165 : vector<8x64xf32>
    %cst_80 = arith.constant 1.42141378 : f32
    %167 = vector.broadcast %cst_80 : f32 to vector<8x64xf32>
    %168 = arith.addf %167, %166 : vector<8x64xf32>
    %169 = arith.mulf %161, %168 : vector<8x64xf32>
    %cst_81 = arith.constant -0.284496725 : f32
    %170 = vector.broadcast %cst_81 : f32 to vector<8x64xf32>
    %171 = arith.addf %170, %169 : vector<8x64xf32>
    %172 = arith.mulf %161, %171 : vector<8x64xf32>
    %cst_82 = arith.constant 0.254829586 : f32
    %173 = vector.broadcast %cst_82 : f32 to vector<8x64xf32>
    %174 = arith.addf %173, %172 : vector<8x64xf32>
    %175 = arith.mulf %161, %174 : vector<8x64xf32>
    %cst_83 = arith.constant 0.000000e+00 : f32
    %176 = vector.broadcast %cst_83 : f32 to vector<8x64xf32>
    %177 = arith.subf %176, %155 : vector<8x64xf32>
    %178 = arith.mulf %177, %155 : vector<8x64xf32>
    %179 = math.exp %178 : vector<8x64xf32>
    %180 = arith.mulf %175, %179 : vector<8x64xf32>
    %cst_84 = arith.constant 1.000000e+00 : f32
    %181 = vector.broadcast %cst_84 : f32 to vector<8x64xf32>
    %182 = arith.subf %181, %180 : vector<8x64xf32>
    %cst_85 = arith.constant 0.000000e+00 : f32
    %183 = vector.broadcast %cst_85 : f32 to vector<8x64xf32>
    %184 = arith.cmpf olt, %154, %183 : vector<8x64xf32>
    %cst_86 = arith.constant 0.000000e+00 : f32
    %185 = vector.broadcast %cst_86 : f32 to vector<8x64xf32>
    %186 = arith.subf %185, %182 : vector<8x64xf32>
    %187 = arith.select %184, %186, %182 : vector<8x64xi1>, vector<8x64xf32>
    %cst_87 = arith.constant 1.000000e+00 : f32
    %188 = vector.broadcast %cst_87 : f32 to vector<8x64xf32>
    %189 = arith.addf %188, %187 : vector<8x64xf32>
    %190 = arith.mulf %152, %189 : vector<8x64xf32>
    %c0_88 = arith.constant 0 : index
    %c0_89 = arith.constant 0 : index
    %191 = vector.load %arg13[%c0_88, %c0_89] : memref<64x32xf32, #tpu.memory_space<vmem>>, vector<64x32xf32>
    %cst_90 = arith.constant dense<0.000000e+00> : vector<8x32xf32>
    %192 = tpu.matmul %190, %191, %cst_90 {dimension_numbers = #tpu.dot_dimension_numbers<[1], [0], [0], [1], [0, 0, 1, 1], [], []>} : vector<8x64xf32>, vector<64x32xf32>, vector<8x32xf32> -> vector<8x32xf32>
    %c0_91 = arith.constant 0 : index
    %c0_92 = arith.constant 0 : index
    %193 = vector.load %arg14[%c0_91, %c0_92] : memref<1x32xf32, #tpu.memory_space<vmem>>, vector<1x32xf32>
    %194 = vector.broadcast %193 : vector<1x32xf32> to vector<8x32xf32>
    %195 = arith.addf %192, %194 : vector<8x32xf32>
    %196 = arith.addf %195, %123 : vector<8x32xf32>
    %c0_93 = arith.constant 0 : index
    %c0_94 = arith.constant 0 : index
    %c0_95 = arith.constant 0 : index
    %197 = vector.load %arg15[%c0_93, %c0_94, %c0_95] : memref<1x8x32xf32, #tpu.memory_space<vmem>>, vector<1x8x32xf32>
    %198 = vector.shape_cast %197 : vector<1x8x32xf32> to vector<8x32xf32>
    %199 = vector.shape_cast %196 : vector<8x32xf32> to vector<1x8x32xf32>
    tpu.vector_store %arg15[%c0_93, %c0_94, %c0_95], %199 {strides = array<i32>} : memref<1x8x32xf32, #tpu.memory_space<vmem>>, vector<1x8x32xf32>,
    return
  }
  func.func @transform_0(%arg0: i32, %arg1: i32) -> (i32, i32, i32) {
    %c0_i32 = arith.constant 0 : i32
    %c0_i32_0 = arith.constant 0 : i32
    %c0_i32_1 = arith.constant 0 : i32
    return %arg0, %c0_i32, %c0_i32_0 : i32, i32, i32
  }
  func.func @transform_1(%arg0: i32, %arg1: i32) -> (i32, i32) {
    %c0_i32 = arith.constant 0 : i32
    %c0_i32_0 = arith.constant 0 : i32
    %c0_i32_1 = arith.constant 0 : i32
    return %c0_i32, %c0_i32_0 : i32, i32
  }
  func.func @transform_2(%arg0: i32, %arg1: i32) -> (i32, i32) {
    %c0_i32 = arith.constant 0 : i32
    %c0_i32_0 = arith.constant 0 : i32
    %c0_i32_1 = arith.constant 0 : i32
    return %c0_i32, %c0_i32_0 : i32, i32
  }
  func.func @transform_3(%arg0: i32, %arg1: i32) -> (i32, i32) {
    %c0_i32 = arith.constant 0 : i32
    %c0_i32_0 = arith.constant 0 : i32
    %c0_i32_1 = arith.constant 0 : i32
    return %c0_i32, %c0_i32_0 : i32, i32
  }
  func.func @transform_4(%arg0: i32, %arg1: i32) -> (i32, i32) {
    %c0_i32 = arith.constant 0 : i32
    %c0_i32_0 = arith.constant 0 : i32
    %c0_i32_1 = arith.constant 0 : i32
    return %c0_i32, %c0_i32_0 : i32, i32
  }
  func.func @transform_5(%arg0: i32, %arg1: i32) -> (i32, i32) {
    %c0_i32 = arith.constant 0 : i32
    %c0_i32_0 = arith.constant 0 : i32
    %c0_i32_1 = arith.constant 0 : i32
    return %c0_i32, %c0_i32_0 : i32, i32
  }
  func.func @transform_6(%arg0: i32, %arg1: i32) -> (i32, i32) {
    %c0_i32 = arith.constant 0 : i32
    %c0_i32_0 = arith.constant 0 : i32
    %c0_i32_1 = arith.constant 0 : i32
    return %c0_i32, %c0_i32_0 : i32, i32
  }
  func.func @transform_7(%arg0: i32, %arg1: i32) -> (i32, i32) {
    %c0_i32 = arith.constant 0 : i32
    %c0_i32_0 = arith.constant 0 : i32
    %c0_i32_1 = arith.constant 0 : i32
    return %c0_i32, %c0_i32_0 : i32, i32
  }
  func.func @transform_8(%arg0: i32, %arg1: i32) -> (i32, i32) {
    %c0_i32 = arith.constant 0 : i32
    %c0_i32_0 = arith.constant 0 : i32
    %c0_i32_1 = arith.constant 0 : i32
    return %c0_i32, %c0_i32_0 : i32, i32
  }
  func.func @transform_9(%arg0: i32, %arg1: i32) -> (i32, i32) {
    %c0_i32 = arith.constant 0 : i32
    %c0_i32_0 = arith.constant 0 : i32
    %c0_i32_1 = arith.constant 0 : i32
    return %c0_i32, %c0_i32_0 : i32, i32
  }
  func.func @transform_10(%arg0: i32, %arg1: i32) -> (i32, i32) {
    %c0_i32 = arith.constant 0 : i32
    %c0_i32_0 = arith.constant 0 : i32
    %c0_i32_1 = arith.constant 0 : i32
    return %c0_i32, %c0_i32_0 : i32, i32
  }
  func.func @transform_11(%arg0: i32, %arg1: i32) -> (i32, i32) {
    %c0_i32 = arith.constant 0 : i32
    %c0_i32_0 = arith.constant 0 : i32
    %c0_i32_1 = arith.constant 0 : i32
    return %c0_i32, %c0_i32_0 : i32, i32
  }
  func.func @transform_12(%arg0: i32, %arg1: i32) -> (i32, i32) {
    %c0_i32 = arith.constant 0 : i32
    %c0_i32_0 = arith.constant 0 : i32
    %c0_i32_1 = arith.constant 0 : i32
    return %c0_i32, %c0_i32_0 : i32, i32
  }
  func.func @transform_13(%arg0: i32, %arg1: i32) -> (i32, i32, i32) {
    %c0_i32 = arith.constant 0 : i32
    %c0_i32_0 = arith.constant 0 : i32
    return %arg0, %arg1, %c0_i32 : i32, i32, i32
  }
}

</mosaic_0001>

<bundles_post_ra>
// kernel: tpu_custom_call.1
= control target key start
LH: loop header
LB: loop body
LE: loop exit
PB: predicated region body
PF: predicated region fallthrough
CT: control target
= control target key end

     0   :  { %s2041_s0 = inlined_call_operand.hbm [shape: f32[2,8,32], index: 0, kind: input, shape index: {}]   ;;  %s2042_s1 = inlined_call_operand.hbm [shape: f32[2,32], index: 1, kind: input, shape index: {}]   ;;  %s2043_s2 = inlined_call_operand.vmem [shape: f32[32,32], index: 2, kind: input, shape index: {}]   ;;  %s2044_s3 = inlined_call_operand.vmem [shape: f32[1,32], index: 3, kind: input, shape index: {}]   ;;  %s2045_s4 = inlined_call_operand.vmem [shape: f32[32,64], index: 4, kind: input, shape index: {}]   ;;  %s2046_s5 = inlined_call_operand.hbm [shape: f32[1,64], index: 5, kind: input, shape index: {}]   ;;  %s2047_s6 = inlined_call_operand.vmem [shape: f32[32,32], index: 6, kind: input, shape index: {}]   ;;  %s2048_s7 = inlined_call_operand.vmem [shape: f32[1,32], index: 7, kind: input, shape index: {}]   ;;  %s2049_s8 = inlined_call_operand.vmem [shape: f32[2,32], index: 8, kind: input, shape index: {}]   ;;  %s2050_s9 = inlined_call_operand.hbm [shape: f32[32,64], index: 9, kind: input, shape index: {}]   ;;  %s2051_s10 = inlined_call_operand.vmem [shape: f32[1,64], index: 10, kind: input, shape index: {}]   ;;  %s2052_s11 = inlined_call_operand.vmem [shape: f32[64,32], index: 11, kind: input, shape index: {}]   ;;  %s2053_s12 = inlined_call_operand.vmem [shape: f32[1,32], index: 12, kind: input, shape index: {}]   ;;  %s2054_s13 = inlined_call_operand.hbm [shape: f32[2,8,32], index: 13, kind: output, shape index: {}]  }
   0x1   :  { %2060 = sst [smem:[#allocation21_spill]] %s2042_s1 }
   0x2   :  { %2061 = sst [smem:[#allocation22_spill]] %s2046_s5 }
   0x3   :  { %2062 = sst [smem:[#allocation23_spill]] %s2050_s9 }
   0x4   :  { %2063 = sst [smem:[#allocation24_spill]] %s2053_s12 }
   0x5   :  { %2064 = sst [smem:[#allocation25_spill]] %s2054_s13 }
   0x6   :  { %18 = vsyncpa [#allocation5], 0 }
   0x7   :  { %20 = vsyncpa [#allocation5 + $0x1], 0 }
   0x8   :  { %21 = vsyncpa [#allocation8], 0 }
   0x9   :  { %22 = vsyncpa [#allocation11], 0 }
   0xa   :  { %23 = vsyncpa [#allocation6], 0 }
   0xb   :  { %25 = vsyncpa [#allocation6 + $0x1], 0  ;;  %s1736_s25 = smov 0   ;;  %s1738_s26 = smov 0  }
   0xc   :  { %s1740_s27 = smov 0   ;;  %s1742_s28 = smov 0  }
   0xd   :  { %s1744_s29 = smov 0   ;;  %s1746_s30 = smov 0  }
   0xe LB: > { %2065 = sst [smem:[#allocation17_spill]] %s1628_s25  ;;  %s1257_s14 = sadd.s32 4294967295, %s1648_s30   ;;  %s1648_s30 = sphi %s1746_s30, %s31_s30   ;;  %s1644_s29 = sphi %s1744_s29, %s2090_s29   ;;  %s1640_s28 = sphi %s1742_s28, %s2089_s28   ;;  %s1636_s27 = sphi %s1740_s27, %s2088_s27   ;;  %s1632_s26 = sphi %s1738_s26, %s2087_s26   ;;  %s1628_s25 = sphi %s1736_s25, %s2086_s25  }
   0xf   : > { %2066 = sst [smem:[#allocation18_spill]] %s1640_s28  ;;  %s1258_s15 = sadd.s32 4294967294, %s1648_s30  }
  0x10   : > { %p63_p0 = scmp.ne.s32.totalorder %s1632_s26, %s1628_s25  ;;  %p1770_p1 = scmp.eq.s32.totalorder %s1257_s14, 0 }
  0x11   : > { %p1774_p2 = scmp.eq.s32.totalorder %s1257_s14, 1  ;;  %p347_p3 = scmp.eq.s32.totalorder %s1258_s15, 1 }
  0x12   : > { %p1780_p4 = por %p1770_p1, %p63_p0  ;;  %p1259_p5 = scmp.ge.s32.totalorder %s1648_s30, 1 }
  0x13   : > { %p1785_p6 = por %p347_p3, %p63_p0  ;;  %p354_p7 = scmp.lt.s32.totalorder %s1648_s30, 3 }
  0x14   : > { %s2072_s1 = sld [smem:[#allocation21_spill]]  ;;  %p1263_p9 = scmp.ge.s32.totalorder %s1648_s30, 2 }
  0x15   : > { %s2070_s19 = scalar_select %p1785_p6, 1, 0 }
  0x16   : > { %p1793_p8 = pnand %p1259_p5, %p354_p7  ;;  %s1650_s24 = smov [#allocation7]  }
  0x17   : > { %2071 = sst [smem:[#allocation19_spill]] %s2070_s19  ;;  %s368_s14 = sshll.u32 %s1650_s24, 4  ;;  %s369_s14 = int_to_ptr.vmem [resolvable:$true] %s368_s14 }
  0x18   : > { %p1309_p10 = pneg %p1793_p8  ;;  %s2074_s5 = sld [smem:[#allocation22_spill]] }
  0x19   : > { %s2076_s9 = sld [smem:[#allocation23_spill]]  ;;  %s1651_s13 = smov [#allocation9]  }
  0x1a   : > { %s366_s22 = sshll.u32 %s2072_s1, 4  ;;  %p1805_p11 = pnand %p1309_p10, %p1770_p1  ;;  %s367_s22 = int_to_ptr.hbm [resolvable:$true] %s366_s22 }
  0x1b   : > { %s389_s25 = sshll.u32 %s1651_s13, 4  ;;  %s1652_s15 = smov [#allocation10]   ;;  %s390_s25 = int_to_ptr.vmem [resolvable:$true] %s389_s25 }
  0x1c   : > { %1312 = dma.hbm_to_vmem [thread:$0]  (!%p1805_p11), %s367_s22, 32, %s369_s14, [#allocation8]  }
  0x1d   : > { %s1653_s1 = smov 128   ;;  %s1654_s21 = smov 8  }
  0x1e   : > { %s387_s19 = sshll.u32 %s2074_s5, 4  ;;  %s409_s5 = sshll.u32 %s1652_s15, 4  ;;  %s388_s19 = int_to_ptr.hbm [resolvable:$true] %s387_s19  ;;  %s410_s5 = int_to_ptr.vmem [resolvable:$true] %s409_s5 }
  0x1f   : > { %s407_s24 = sshll.u32 %s2076_s9, 4  ;;  %s50_s13 = sadd.s32 1, %s1636_s27  ;;  %s408_s24 = int_to_ptr.hbm [resolvable:$true] %s407_s24 }
  0x20   : > { %1315 = dma.hbm_to_vmem [thread:$0]  (!%p1805_p11), %s388_s19, 16, %s390_s25, [#allocation8]  }
  0x21   : > { %1318 = dma.hbm_to_vmem [thread:$0]  (!%p1805_p11), %s408_s24, 512, %s410_s5, [#allocation11], %s1653_s1, %s1653_s1, %s1654_s21  }
  0x22   : > { %s43_s9 = sadd.s32 1, %s1644_s29  ;;  %p57_p12 = scmp.ne.s32.totalorder %s1636_s27, %s1632_s26 }
  0x23   : > { %p45_p13 = scmp.ge.s32.totalorder %s43_s9, 2  ;;  %p58_p0 = scmp.eq.s32.totalorder %s1648_s30, 0 }
  0x24   : > { %p1825_p3 = por %p1774_p2, %p57_p12  ;;  %p1330_p5 = scmp.lt.s32.totalorder %s1648_s30, 2 }
  0x25   : > { %s2092_s9 = smov (%p45_p13, %s43_s9), 0  ;;  %p1832_p7 = por %p58_p0, %p57_p12 }
  0x26   : > { %s2077_s22 = scalar_select %p1825_p3, 1, 0 }
  0x27   : > { %s432_s5 = sand.u32 1, %s1636_s27   ;;  %s47_s14 = ssub.s32 %s1644_s29, %s2092_s9 }
  0x28   : > { %2078 = sst [smem:[#allocation20_spill]] %s2077_s22  ;;  %p48_p10 = scmp.eq.s32.totalorder %s47_s14, 0 }
  0x29   : > { %s1264_s20 = sshll.u32 %s432_s5, 3  ;;  %s1265_s24 = sshll.u32 %s1644_s29, 3 }
  0x2a   : > { %s1841_s17 = scalar_select %p48_p10, %s1636_s27, %s50_s13  }
  0x2b   : > { %s440_s1 = scalar_lea.hbm %s2041_s0, %s1265_s24  ;;  %s436_s21 = scalar_lea.vmem [#allocation4], %s1264_s20 }
  0x2c   : > { %s444_s22 = sshll.u32 %s436_s21, 4  ;;  %s442_s12 = sshll.u32 %s440_s1, 4  ;;  %s445_s22 = int_to_ptr.vmem [resolvable:$true] %s444_s22  ;;  %s443_s12 = int_to_ptr.hbm [resolvable:$true] %s442_s12 }
  0x2d   : > { %p1320_p2 = pnand %p1330_p5, %p1832_p7  ;;  %s433_s28 = scalar_lea.sflag [#allocation5], %s432_s5 }
  0x2e   : > { %453 = sbr.rel (%p1793_p8) target bundleno = 1824 (0x720), region = 72  ;;  %s1853_s13 = sand.u32 (!%p1793_p8), 1, %s1632_s26  }
  0x2f   : > { %1322 = dma.hbm_to_vmem [thread:$0]  (!%p1320_p2), %s443_s12, 128, %s445_s22, %s433_s28  }
  0x30   : > { %s1267_s14 = sshll.u32 (!%p1793_p8), %s1853_s13, 3  ;;  %s456_s20 = scalar_lea.sflag (!%p1793_p8), [#allocation5], %s1853_s13 }
  0x31   : > { %s459_s24 = scalar_lea.vmem (!%p1793_p8), [#allocation4], %s1267_s14 }
  0x33   : > { %1611 = dma.done.wait (%p1780_p4), %s456_s20, 128  }
  0x34   : > { %1613 = vsyncadd (%p1780_p4), %s456_s20, 4294967168 }
  0x35   : > { %1615 = dma.done.wait (%p1770_p1), [#allocation8], 48  }
  0x36   : > { %1617 = vsyncadd (%p1770_p1), [#allocation8], 4294967248 }
  0x37   : > { %1619 = dma.done.wait (%p1770_p1), [#allocation11], 512  }
  0x38   : > { %1621 = vsyncadd (%p1770_p1), [#allocation11], 4294966784  ;;  %vm523_vm0 = vcmask 261120   ;;  %v1871_v0 = vld [vmem:[%s459_s24] sm:$0xff]  ;;  %v1655_v2 = vmov 32.0   ;;  %v560_v21 = vld [vmem:[%s2045_s4 + $0x8] sm:$0xff] }
  0x39   : > { %v524_v1 = vsel %vm523_vm0, %v1871_v0, 0.0  ;;  %1410 = vrcp.f32 %v1655_v2  ;;  %v562_v19 = vld [vmem:[%s2045_s4 + $0x18] sm:$0xff]  ;;  %v561_v20 = vld [vmem:[%s2045_s4 + $0x10] sm:$0xff]  ;;  %v559_v22 = vld [vmem:[%s2045_s4] sm:$0xff]  ;;  %vm590_vm8 = vcmask 523264   ;;  %vm664_vm9 = vcmask 64512  }
  0x3a   : > { %525 = vadd.xlane.f32.xlu0 %v524_v1  ;;  %582 = vmatpush.msra.mxu0 %v562_v19  ;;  %v634_v23 = vld [vmem:[%s2043_s2 + $0x18] sm:$0xff]  ;;  %v633_v24 = vld [vmem:[%s2043_s2 + $0x10] sm:$0xff]  ;;  %v632_v25 = vld [vmem:[%s2043_s2 + $0x8] sm:$0xff]  ;;  %s1656_s23 = smov 104   ;;  %s1657_s22 = smov 120   ;;  %vm806_vm10 = vcmask 130112  }
  0x3b   : > { %654 = vmatpush.msra.mxu1 %v634_v23  ;;  %v631_v28 = vld [vmem:[%s2043_s2] sm:$0xff]  ;;  %s1658_s19 = smov 96   ;;  %s1659_s5 = smov 112   ;;  %vm882_vm11 = vcmask 195712   ;;  %vm958_vm12 = vcmask 261312  }
  0x3c   : > { %583 = vmatpush.msra.mxu0 %v561_v20  ;;  %v1399_v41 = vld [vmem:[#allocation7] ss:$0 sm:$0xff]  ;;  %v1400_v45 = vld [vmem:[#allocation7 + $0x1] ss:$0 sm:$0xff]  ;;  %v1403_v57 = vld [vmem:[#allocation9] ss:$0 sm:$0xff] }
  0x3d   : > { %655 = vmatpush.msra.mxu1 %v633_v24  ;;  %v1401_v51 = vld [vmem:[#allocation7] ss:$0 sm:$0xff]  ;;  %v1402_v54 = vld [vmem:[#allocation7 + $0x1] ss:$0 sm:$0xff]  ;;  %s1660_s25 = smov 88   ;;  %s1661_s15 = smov 72  }
  0x3e   : > { %584 = vmatpush.msra.mxu0 %v560_v21  ;;  %v1404_v60 = vld [vmem:[%s2044_s3] ss:$0 sm:$0xff]  ;;  %s1662_s1 = smov 80   ;;  %s1663_s21 = smov 8  }
  0x3f   : > { %v1411_v3 = vpop.eup %1410  ;;  %656 = vmatpush.msra.mxu1 %v632_v25  ;;  %s1664_s20 = smov 24   ;;  %s1665_s24 = smov 16  }
  0x40   : > { %v528_v4 = vmul.f32 32.0, %v1411_v3  ;;  %vm532_vm1 = vweird.f32 %v1411_v3  ;;  %585 = vmatpush.msra.mxu0 %v559_v22  ;;  %s517_s12 = scalar_lea.vmem [#allocation12], %s1267_s14  ;;  %s1131_s18 = scalar_lea.sflag [#allocation6], %s1853_s13 }
  0x41   : > { %657 = vmatpush.msra.mxu1 %v631_v28  ;;  %s1144_s28 = sshll.u32 %s517_s12, 4  ;;  %s1145_s28 = int_to_ptr.vmem [resolvable:$true] %s1144_s28 }
  0x42   : > { %597 = vadd.xlane.f32.xlu0 %v524_v1  ;;  %v529_v5 = vsub.f32 1.0, %v528_v4 }
  0x44   : > { %v530_v6 = vmul.f32 %v1411_v3, %v529_v5 }
  0x46   : > { %v531_v7 = vadd.f32 %v1411_v3, %v530_v6 }
  0x48   : > { %v1875_v8 = vsel %vm532_vm1, %v1411_v3, %v531_v7 }
  0xad   : > { %v526_v9 = vpop.xlane.xlu0 %525 }
  0xae   : > { %v534_v10 = vmul.f32 %v1875_v8, %v526_v9 }
  0xb0   : > { %v535_v11 = vsub.f32 %v1871_v0, %v534_v10 }
  0xb2   : > { %v536_v12 = vmul.f32 %v535_v11, %v535_v11 }
  0xb4   : > { %v537_v13 = vsel %vm523_vm0, %v536_v12, 0.0 }
  0xb5   : > { %538 = vadd.xlane.f32.xlu1 %v537_v13  ;;  %v598_v14 = vpop.xlane.xlu0 %597 }
  0xb6   : > { %v606_v15 = vmul.f32 %v598_v14, %v1875_v8 }
  0xb8   : > { %v607_v16 = vsub.f32 %v1871_v0, %v606_v15 }
  0xba   : > { %v608_v17 = vmul.f32 %v607_v16, %v607_v16 }
  0xbc   : > { %v609_v18 = vsel %vm523_vm0, %v608_v17, 0.0 }
  0xbd   : > { %610 = vadd.xlane.f32.xlu1 %v609_v18 }
 0x128   : > { %v539_v26 = vpop.xlane.xlu1 %538 }
 0x129   : > { %v540_v27 = vmul.f32 %v539_v26, %v1875_v8 }
 0x12b   : > { %v541_v29 = vadd.f32 1e-05, %v540_v27 }
 0x12d   : > { %1412 = vrsqrt.f32 %v541_v29  ;;  %vm548_vm3 = vweird.f32 %v541_v29 }
 0x130   : > { %v611_v30 = vpop.xlane.xlu1 %610 }
 0x131   : > { %v612_v31 = vmul.f32 %v611_v30, %v1875_v8 }
 0x133   : > { %v1413_v32 = vpop.eup %1412  ;;  %v613_v33 = vadd.f32 1e-05, %v612_v31 }
 0x134   : > { %v543_v34 = vmul.f32 %v1413_v32, %v541_v29  ;;  %vm549_vm2 = vweird.f32 %v1413_v32 }
 0x135   : > { %1414 = vrsqrt.f32 %v613_v33  ;;  %vm550_vm4 = vmor %vm548_vm3, %vm549_vm2  ;;  %vm620_vm6 = vweird.f32 %v613_v33 }
 0x136   : > { %v544_v35 = vmul.f32 %v1413_v32, %v543_v34 }
 0x138   : > { %v545_v36 = vmul.f32 0.5, %v544_v35 }
 0x13a   : > { %v546_v37 = vsub.f32 1.5, %v545_v36 }
 0x13b   : > { %v1415_v38 = vpop.eup %1414 }
 0x13c   : > { %v547_v39 = vmul.f32 %v1413_v32, %v546_v37  ;;  %v615_v40 = vmul.f32 %v1415_v38, %v613_v33  ;;  %vm621_vm5 = vweird.f32 %v1415_v38 }
 0x13d   : > { %vm622_vm7 = vmor %vm620_vm6, %vm621_vm5 }
 0x13e   : > { %v551_v42 = vsel %vm550_vm4, %v1413_v32, %v547_v39  ;;  %v616_v43 = vmul.f32 %v1415_v38, %v615_v40 }
 0x13f   : > { %v552_v44 = vmul.f32 %v551_v42, %v535_v11 }
 0x140   : > { %v617_v46 = vmul.f32 0.5, %v616_v43 }
 0x141   : > { %v555_v47 = vmul.f32 %v1399_v41, %v552_v44 }
 0x142   : > { %v618_v48 = vsub.f32 1.5, %v617_v46 }
 0x143   : > { %v558_v49 = vadd.f32 %v1400_v45, %v555_v47 }
 0x144   : > { %v619_v50 = vmul.f32 %v1415_v38, %v618_v48 }
 0x145   : > { %1272 = vmatmul.msk.f32.vlgmr.msra.gmra.mxu0 %vm523_vm0, %v558_v49 }
 0x146   : > { %v623_v52 = vsel %vm622_vm7, %v1415_v38, %v619_v50 }
 0x147   : > { %v624_v53 = vmul.f32 %v623_v52, %v607_v16 }
 0x149   : > { %v627_v55 = vmul.f32 %v1401_v51, %v624_v53 }
 0x14b   : > { %v630_v56 = vadd.f32 %v1402_v54, %v627_v55 }
 0x14d   : > { %1273 = vmatmul.msk.f32.vlgmr.msra.gmra.mxu1 %vm523_vm0, %v630_v56 }
 0x1c2   : > { %v587_v58 = vpop.f32.mrf.mxu0 }
 0x1c3   : > { %v588_v59 = vadd.f32 %v1403_v57, %v587_v58 }
 0x1c5   : > { %591 = vst.msk [vmem:[#allocation2] sm:$0xff] %vm590_vm8, %v588_v59 }
 0x1ca   : > { %v659_v61 = vpop.f32.mrf.mxu1 }
 0x1cb   : > { %v660_v62 = vadd.f32 %v1404_v60, %v659_v61 }
 0x1cc   : > { %v884_v63 = vld [vmem:[#allocation2] sm:$0xff] }
 0x1cd   : > { %v662_v1 = vmul.f32 0.35355338, %v660_v62  ;;  %888 = vrot.lane.b32.xlu0 %v884_v63, %s1656_s23  ;;  %736 = vrot.lane.b32.xlu2 %v884_v63, %s1657_s22 }
 0x1ce   : > { %1274 = vmatpush.xpose.msk.msra.mxu2 %vm664_vm9, %v884_v63 }
 0x1cf   : > { %885 = vrot.lane.b32.xlu1 %v662_v1, %s1656_s23  ;;  %s2080_s23 = sld [smem:[#allocation18_spill]] }
 0x1d1   : > { %1275 = vmatmul.msk.f32.vlgmr.msra.gmra.mxu2 %vm664_vm9, %v662_v1 }
 0x1d5   : > { %733 = vrot.lane.b32.xlu2 %v662_v1, %s1657_s22  ;;  %s1290_s22 = sshll.u32 %s2080_s23, 3 }
 0x1d7   : > { %704 = vrot.lane.b32.xlu1 %v884_v63, %s1658_s19 }
 0x1dd   : > { %812 = vrot.lane.b32.xlu2 %v884_v63, %s1659_s5 }
 0x1e5   : > { %809 = vrot.lane.b32.xlu2 %v662_v1, %s1659_s5 }
 0x227   : > { %v737_v2 = vpop.permute.xlu2 %736 }
 0x228   : > { %1277 = vmatpush.xpose.msk.msra.mxu3 %vm664_vm9, %v737_v2 }
 0x22f   : > { %v734_v3 = vpop.permute.xlu2 %733 }
 0x230   : > { %1278 = vmatmul.msk.f32.vlgmr.msra.gmra.mxu3 %vm664_vm9, %v734_v3 }
 0x237   : > { %v813_v4 = vpop.permute.xlu2 %812 }
 0x238   : > { %1280 = vmatpush.xpose.msk.msrb.mxu0 %vm664_vm9, %v813_v4 }
 0x23f   : > { %v810_v5 = vpop.permute.xlu2 %809  ;;  %v889_v6 = vpop.permute.xlu0 %888 }
 0x240   : > { %1281 = vmatmul.msk.f32.vlgmr.msrb.gmra.mxu0 %vm664_vm9, %v810_v5  ;;  %1283 = vmatpush.xpose.msk.msrb.mxu3 %vm664_vm9, %v889_v6 }
 0x241   : > { %v886_v7 = vpop.permute.xlu1 %885 }
 0x243   : > { %1284 = vmatmul.msk.f32.vlgmr.msrb.gmra.mxu3 %vm664_vm9, %v886_v7  ;;  %v964_v7 = vld [vmem:[%s2047_s6 + $0x18] sm:$0xff] }
 0x244   : > { %984 = vmatpush.msra.mxu0 %v964_v7 }
 0x249   : > { %v705_v9 = vpop.permute.xlu1 %704 }
 0x24a   : > { %725 = vmatpush.msrb.mxu2 %v705_v9  ;;  %v963_v9 = vld [vmem:[%s2047_s6 + $0x10] sm:$0xff] }
 0x24b   : > { %985 = vmatpush.msra.mxu0 %v963_v9 }
 0x254   : > { %v688_v10 = vpop.f32.mrf.mxu2 }
 0x255   : > { %v691_v11 = vsel %vm664_vm9, %v688_v10, -inf }
 0x256   : > { %692 = vmax.xlane.f32.xlu2 %v691_v11  ;;  %v961_v11 = vld [vmem:[%s2047_s6] sm:$0xff] }
 0x26e   : > { %775 = vrot.lane.b32.xlu2 %v884_v63, %s1660_s25  ;;  %s2081_s25 = sld [smem:[#allocation24_spill]] }
 0x2b3   : > { %v759_v13 = vpop.f32.mrf.mxu3 }
 0x2b4   : > { %v762_v16 = vsel %vm664_vm9, %v759_v13, -inf }
 0x2bd   : > { %v835_v12 = vpop.f32.mrf.mxu0 }
 0x2be   : > { %v838_v14 = vsel %vm664_vm9, %v835_v12, -inf }
 0x2bf   : > { %839 = vmax.xlane.f32.xlu0 %v838_v14 }
 0x2c6   : > { %v911_v15 = vpop.f32.mrf.mxu3 }
 0x2c7   : > { %763 = vmax.xlane.f32.xlu0 %v762_v16  ;;  %v914_v17 = vsel %vm664_vm9, %v911_v15, -inf }
 0x2c8   : > { %915 = vmax.xlane.f32.xlu1 %v914_v17 }
 0x2c9   : > { %v693_v18 = vpop.xlane.xlu2 %692 }
 0x2ca   : > { %v694_v19 = vsub.f32 %v688_v10, %v693_v18  ;;  %v962_v10 = vld [vmem:[%s2047_s6 + $0x8] sm:$0xff] }
 0x2cb   : > { %986 = vmatpush.msra.mxu0 %v962_v10 }
 0x2cc   : > { %v695_v20 = vmul.f32 1.442695, %v694_v19 }
 0x2cd   : > { %987 = vmatpush.msra.mxu0 %v961_v11 }
 0x2ce   : > { %1416 = vpow2.f32 %v695_v20 }
 0x2d1   : > { %v776_v21 = vpop.permute.xlu2 %775 }
 0x2d2   : > { %796 = vmatpush.msra.mxu2 %v776_v21 }
 0x2d4   : > { %v1417_v22 = vpop.eup %1416 }
 0x2d5   : > { %1276 = vmatmul.msk.f32.vlgmr.msrb.gmra.mxu2 %vm664_vm9, %v1417_v22  ;;  %v697_v39 = vsel %vm664_vm9, %v1417_v22, 0.0 }
 0x2db   : > { %927 = vrot.lane.b32.xlu0 %v884_v63, %s1661_s15 }
 0x2e1   : > { %851 = vrot.lane.b32.xlu1 %v884_v63, %s1662_s1 }
 0x332   : > { %v840_v23 = vpop.xlane.xlu0 %839 }
 0x333   : > { %v841_v24 = vsub.f32 %v835_v12, %v840_v23 }
 0x335   : > { %v842_v25 = vmul.f32 1.442695, %v841_v24 }
 0x337   : > { %1418 = vpow2.f32 %v842_v25  ;;  %v1024_v25 = vld [vmem:[#allocation10 + $0x18] sm:$0xff] }
 0x33a   : > { %v764_v26 = vpop.xlane.xlu0 %763 }
 0x33b   : > { %v765_v27 = vsub.f32 %v759_v13, %v764_v26  ;;  %v916_v28 = vpop.xlane.xlu1 %915  ;;  %v1023_v26 = vld [vmem:[#allocation10 + $0x10] sm:$0xff] }
 0x33c   : > { %v917_v29 = vsub.f32 %v911_v15, %v916_v28  ;;  %v1405_v15 = vld [vmem:[%s2048_s7] ss:$0 sm:$0xff] }
 0x33d   : > { %v1419_v30 = vpop.eup %1418  ;;  %v766_v31 = vmul.f32 1.442695, %v765_v27  ;;  %v1022_v27 = vld [vmem:[#allocation10 + $0x8] sm:$0xff] }
 0x33e   : > { %v918_v32 = vmul.f32 1.442695, %v917_v29  ;;  %v844_v33 = vsel %vm664_vm9, %v1419_v30, 0.0 }
 0x33f   : > { %1420 = vpow2.f32 %v766_v31  ;;  %845 = vadd.xlane.f32.xlu0 %v844_v33 }
 0x340   : > { %1422 = vpow2.f32 %v918_v32 }
 0x345   : > { %v1421_v34 = vpop.eup %1420 }
 0x346   : > { %v1423_v35 = vpop.eup %1422  ;;  %1279 = vmatmul.msk.f32.vlgmr.msra.gmra.mxu2 %vm664_vm9, %v1421_v34  ;;  %v768_v36 = vsel %vm664_vm9, %v1421_v34, 0.0 }
 0x347   : > { %769 = vadd.xlane.f32.xlu2 %v768_v36  ;;  %v920_v37 = vsel %vm664_vm9, %v1423_v35, 0.0 }
 0x348   : > { %921 = vadd.xlane.f32.xlu1 %v920_v37  ;;  %v1406_v37 = vld [vmem:[%s2049_s8] ss:$0 sm:$0xff] }
 0x34d   : > { %v928_v38 = vpop.permute.xlu0 %927 }
 0x34e   : > { %948 = vmatpush.msrb.mxu2 %v928_v38 }
 0x34f   : > { %698 = vadd.xlane.f32.xlu2 %v697_v39  ;;  %1285 = vmatmul.msk.f32.vlgmr.msrb.gmra.mxu2 %vm664_vm9, %v1423_v35 }
 0x353   : > { %v852_v40 = vpop.permute.xlu1 %851 }
 0x354   : > { %872 = vmatpush.msrb.mxu1 %v852_v40 }
 0x355   : > { %1282 = vmatmul.msk.f32.vlgmr.msrb.gmra.mxu1 %vm664_vm9, %v1419_v30 }
 0x356   : > { %1044 = vmatpush.msra.mxu1 %v1024_v25 }
 0x358   : > { %v727_v45 = vpop.f32.mrf.mxu2  ;;  %1045 = vmatpush.msra.mxu1 %v1023_v26  ;;  %v1409_v26 = vld [vmem:[%s2081_s25] ss:$0 sm:$0xff] }
 0x35a   : > { %1046 = vmatpush.msra.mxu1 %v1022_v27 }
 0x3b2   : > { %v846_v42 = vpop.xlane.xlu0 %845 }
 0x3ba   : > { %v770_v41 = vpop.xlane.xlu2 %769 }
 0x3bb   : > { %1424 = vrcp.f32 %v770_v41  ;;  %v922_v43 = vpop.xlane.xlu1 %921 }
 0x3bc   : > { %1426 = vrcp.f32 %v846_v42 }
 0x3bd   : > { %1428 = vrcp.f32 %v922_v43 }
 0x3c1   : > { %v1425_v44 = vpop.eup %1424 }
 0x3c2   : > { %v772_v46 = vmul.f32 %v1425_v44, %v770_v41  ;;  %v699_v47 = vpop.xlane.xlu2 %698  ;;  %v1427_v49 = vpop.eup %1426 }
 0x3c3   : > { %1430 = vrcp.f32 %v699_v47  ;;  %v1429_v50 = vpop.eup %1428  ;;  %v848_v53 = vmul.f32 %v1427_v49, %v846_v42  ;;  %v1408_v42 = vld [vmem:[%s2051_s10] ss:$0 sm:$0xff] }
 0x3c4   : > { %v773_v48 = vsub.f32 2.0, %v772_v46  ;;  %v924_v54 = vmul.f32 %v1429_v50, %v922_v43 }
 0x3c5   : > { %v849_v59 = vsub.f32 2.0, %v848_v53 }
 0x3c6   : > { %v774_v51 = vmul.f32 %v1425_v44, %v773_v48  ;;  %v925_v60 = vsub.f32 2.0, %v924_v54 }
 0x3c7   : > { %v850_v63 = vmul.f32 %v1427_v49, %v849_v59  ;;  %v1099_v49 = vld [vmem:[%s2052_s11 + $0x38] sm:$0xff] }
 0x3c8   : > { %v926_v1 = vmul.f32 %v1429_v50, %v925_v60  ;;  %1116 = vmatpush.msra.mxu3 %v1099_v49  ;;  %v1098_v50 = vld [vmem:[%s2052_s11 + $0x30] sm:$0xff] }
 0x3c9   : > { %v1431_v52 = vpop.eup %1430  ;;  %v798_v55 = vpop.f32.mrf.mxu2 }
 0x3ca   : > { %v701_v56 = vmul.f32 %v1431_v52, %v699_v47  ;;  %v801_v57 = vmul.f32 %v798_v55, %v774_v51  ;;  %1117 = vmatpush.msra.mxu3 %v1098_v50  ;;  %v1097_v51 = vld [vmem:[%s2052_s11 + $0x28] sm:$0xff]  ;;  %v1095_v55 = vld [vmem:[%s2052_s11 + $0x18] sm:$0xff] }
 0x3cc   : > { %v702_v58 = vsub.f32 2.0, %v701_v56  ;;  %803 = vrot.lane.b32.xlu2 %v801_v57, %s1663_s21  ;;  %1118 = vmatpush.msra.mxu3 %v1097_v51  ;;  %v1094_v57 = vld [vmem:[%s2052_s11 + $0x10] sm:$0xff]  ;;  %s2082_s21 = sld [smem:[#allocation25_spill]] }
 0x3ce   : > { %v703_v61 = vmul.f32 %v1431_v52, %v702_v58  ;;  %v1096_v52 = vld [vmem:[%s2052_s11 + $0x20] sm:$0xff] }
 0x3cf   : > { %1119 = vmatpush.msra.mxu3 %v1096_v52 }
 0x3d0   : > { %v730_v62 = vmul.f32 %v727_v45, %v703_v61  ;;  %v1093_v61 = vld [vmem:[%s2052_s11 + $0x8] sm:$0xff] }
 0x3d1   : > { %1120 = vmatpush.msra.mxu3 %v1095_v55 }
 0x3d2   : > { %731 = vst.msk [vmem:[#allocation3] sm:$0xff] %vm664_vm9, %v730_v62  ;;  %v874_v2 = vpop.f32.mrf.mxu1  ;;  %v950_v3 = vpop.f32.mrf.mxu2  ;;  %v1092_v62 = vld [vmem:[%s2052_s11] sm:$0xff]  ;;  %s1578_s14 = scalar_lea.hbm %s2082_s21, 16 }
 0x3d3   : > { %v877_v4 = vmul.f32 %v874_v2, %v850_v63  ;;  %v953_v5 = vmul.f32 %v950_v3, %v926_v1  ;;  %1121 = vmatpush.msra.mxu3 %v1094_v57 }
 0x3d5   : > { %955 = vrot.lane.b32.xlu1 %v953_v5, %s1664_s20  ;;  %879 = vrot.lane.b32.xlu0 %v877_v4, %s1665_s24  ;;  %s1142_s24 = scalar_lea.hbm %s2082_s21, %s1290_s22 }
 0x3d6   : > { %1122 = vmatpush.msra.mxu3 %v1093_v61  ;;  %s1146_s16 = sshll.u32 %s1142_s24, 4  ;;  %s1147_s16 = int_to_ptr.hbm [resolvable:$true] %s1146_s16 }
 0x3d7   : > { %s1572_s23 = sshra.s32 %s1147_s16, 4  ;;  %s1573_s23 = int_to_ptr.hbm [resolvable:$true] %s1572_s23 }
 0x3d8   : > { %1123 = vmatpush.msra.mxu3 %v1092_v62  ;;  %s1574_s19 = scalar_lea.hbm %s1573_s23, 8  ;;  %p1579_p11 = scmp.lt.s32.totalorder %s1573_s23, %s2082_s21 }
 0x3d9   : > { %p1575_p1 = scmp.ne.s32.totalorder %s1573_s23, %s1574_s19  ;;  %p1580_p12 = scmp.lt.s32.totalorder %s1578_s14, %s1574_s19 }
 0x3db   : > { %p1576_p4 = pnand %p1575_p1, %p1825_p3  ;;  %p1581_p13 = por %p1580_p12, %p1579_p11 }
 0x3dd   : > { %p1577_p8 = pneg %p1576_p4 }
 0x3df   : > { %p1582_p0 = pnand %p1581_p13, %p1577_p8 }
 0x426   : > { %v804_v6 = vpop.permute.xlu2 %803 }
 0x427   : > { %807 = vst.msk [vmem:[#allocation3] sm:$0xff] %vm806_vm10, %v804_v6 }
 0x447   : > { %v956_v12 = vpop.permute.xlu1 %955  ;;  %v880_v13 = vpop.permute.xlu0 %879 }
 0x448   : > { %883 = vst.msk [vmem:[#allocation3] sm:$0xff] %vm882_vm11, %v880_v13 }
 0x449   : > { %959 = vst.msk [vmem:[#allocation3] sm:$0xff] %vm958_vm12, %v956_v12 }
 0x450   : > { %v960_v14 = vld [vmem:[#allocation3] sm:$0xff] }
 0x451   : > { %1286 = vmatmul.msk.f32.vlgmr.msra.gmra.mxu0 %vm523_vm0, %v960_v14 }
 0x4ce   : > { %v989_v16 = vpop.f32.mrf.mxu0 }
 0x4cf   : > { %v990_v17 = vadd.f32 %v1405_v15, %v989_v16 }
 0x4d1   : > { %v1953_v18 = vadd.f32 %v990_v17, %v1871_v0  ;;  %v1021_v0 = vld [vmem:[#allocation10] sm:$0xff] }
 0x4d2   : > { %1047 = vmatpush.msra.mxu1 %v1021_v0 }
 0x4d3   : > { %v993_v19 = vsel %vm523_vm0, %v1953_v18, 0.0 }
 0x4d4   : > { %994 = vadd.xlane.f32.xlu0 %v993_v19 }
 0x547   : > { %v995_v20 = vpop.xlane.xlu0 %994 }
 0x548   : > { %v996_v21 = vmul.f32 %v995_v20, %v1875_v8 }
 0x54a   : > { %v997_v22 = vsub.f32 %v1953_v18, %v996_v21 }
 0x54c   : > { %v998_v23 = vmul.f32 %v997_v22, %v997_v22 }
 0x54e   : > { %v999_v24 = vsel %vm523_vm0, %v998_v23, 0.0 }
 0x54f   : > { %1000 = vadd.xlane.f32.xlu2 %v999_v24 }
 0x5c2   : > { %v1001_v28 = vpop.xlane.xlu2 %1000 }
 0x5c3   : > { %v1002_v29 = vmul.f32 %v1001_v28, %v1875_v8  ;;  %v1407_v8 = vld [vmem:[%s2049_s8 + $0x1] ss:$0 sm:$0xff] }
 0x5c5   : > { %v1003_v30 = vadd.f32 1e-05, %v1002_v29 }
 0x5c7   : > { %1432 = vrsqrt.f32 %v1003_v30  ;;  %vm1010_vm14 = vweird.f32 %v1003_v30 }
 0x5cd   : > { %v1433_v31 = vpop.eup %1432 }
 0x5ce   : > { %v1005_v32 = vmul.f32 %v1433_v31, %v1003_v30  ;;  %vm1011_vm13 = vweird.f32 %v1433_v31 }
 0x5cf   : > { %vm1012_vm15 = vmor %vm1010_vm14, %vm1011_vm13 }
 0x5d0   : > { %v1006_v33 = vmul.f32 %v1433_v31, %v1005_v32 }
 0x5d2   : > { %v1007_v34 = vmul.f32 0.5, %v1006_v33 }
 0x5d4   : > { %v1008_v35 = vsub.f32 1.5, %v1007_v34 }
 0x5d6   : > { %v1009_v36 = vmul.f32 %v1433_v31, %v1008_v35 }
 0x5d8   : > { %v1013_v38 = vsel %vm1012_vm15, %v1433_v31, %v1009_v36 }
 0x5d9   : > { %v1014_v39 = vmul.f32 %v1013_v38, %v997_v22 }
 0x5db   : > { %v1017_v40 = vmul.f32 %v1406_v37, %v1014_v39 }
 0x5dd   : > { %v1020_v41 = vadd.f32 %v1407_v8, %v1017_v40 }
 0x5df   : > { %1287 = vmatmul.msk.f32.vlgmr.msra.gmra.mxu1 %vm523_vm0, %v1020_v41 }
 0x65c   : > { %v1049_v43 = vpop.f32.mrf.mxu1 }
 0x65d   : > { %v1050_v44 = vadd.f32 %v1408_v42, %v1049_v43 }
 0x65f   : > { %v1053_v45 = vmul.f32 0.70710677, %v1050_v44  ;;  %v1052_v23 = vmul.f32 0.5, %v1050_v44 }
 0x661   : > { %v1054_v46 = vand.u32 2147483647, %v1053_v45  ;;  %vm1087_vm5 = vcmp.lt.f32.partialorder %v1053_v45, 0.0 }
 0x663   : > { %v1055_v47 = vmul.f32 0.3275911, %v1054_v46  ;;  %v1081_v4 = vsub.f32 0.0, %v1054_v46 }
 0x665   : > { %v1056_v48 = vadd.f32 1.0, %v1055_v47  ;;  %v1082_v7 = vmul.f32 %v1081_v4, %v1054_v46 }
 0x667   : > { %1434 = vrcp.f32 %v1056_v48  ;;  %v1068_v58 = vand.u32 2147483648, %v1056_v48  ;;  %v1066_v60 = vand.u32 2147483647, %v1056_v48  ;;  %vm1062_vm2 = vweird.f32 %v1056_v48 }
 0x668   : > { %v1083_v11 = vmul.f32 1.442695, %v1082_v7 }
 0x669   : > { %v1069_v1 = vor.u32 1.1754944e-38, %v1068_v58  ;;  %vm1067_vm4 = vcmp.eq.f32.partialorder %v1066_v60, 8.507059e+37 }
 0x66a   : > { %1436 = vpow2.f32 %v1083_v11 }
 0x66d   : > { %v1435_v53 = vpop.eup %1434 }
 0x66e   : > { %v1058_v54 = vmul.f32 %v1435_v53, %v1056_v48  ;;  %vm1063_vm1 = vweird.f32 %v1435_v53 }
 0x66f   : > { %vm1064_vm3 = vmor %vm1062_vm2, %vm1063_vm1 }
 0x670   : > { %v1059_v56 = vsub.f32 1.0, %v1058_v54  ;;  %v1437_v17 = vpop.eup %1436 }
 0x672   : > { %v1060_v59 = vmul.f32 %v1435_v53, %v1059_v56 }
 0x674   : > { %v1061_v63 = vadd.f32 %v1435_v53, %v1060_v59 }
 0x676   : > { %v1065_v2 = vsel %vm1064_vm3, %v1435_v53, %v1061_v63 }
 0x677   : > { %v1070_v3 = vsel %vm1067_vm4, %v1069_v1, %v1065_v2 }
 0x678   : > { %v1072_v5 = vmul.f32 1.0614054, %v1070_v3 }
 0x67a   : > { %v1073_v6 = vadd.f32 -1.4531521, %v1072_v5 }
 0x67c   : > { %v1074_v9 = vmul.f32 %v1073_v6, %v1070_v3 }
 0x67e   : > { %v1075_v10 = vadd.f32 1.4214138, %v1074_v9 }
 0x680   : > { %v1076_v12 = vmul.f32 %v1075_v10, %v1070_v3 }
 0x682   : > { %v1077_v13 = vadd.f32 -0.28449672, %v1076_v12 }
 0x684   : > { %v1078_v14 = vmul.f32 %v1077_v13, %v1070_v3 }
 0x686   : > { %v1079_v15 = vadd.f32 0.2548296, %v1078_v14 }
 0x688   : > { %v1080_v16 = vmul.f32 %v1079_v15, %v1070_v3 }
 0x68a   : > { %v1085_v19 = vmul.f32 %v1437_v17, %v1080_v16 }
 0x68c   : > { %v1086_v20 = vsub.f32 1.0, %v1085_v19 }
 0x68e   : > { %v1088_v21 = vsub.f32 0.0, %v1086_v20 }
 0x690   : > { %v1089_v22 = vsel %vm1087_vm5, %v1088_v21, %v1086_v20 }
 0x691   : > { %v1090_v24 = vadd.f32 1.0, %v1089_v22 }
 0x693   : > { %v1091_v25 = vmul.f32 %v1090_v24, %v1052_v23 }
 0x695   : > { %1288 = vmatmul.msk.f32.vlgmr.msra.gmra.mxu3 %vm590_vm8, %v1091_v25 }
 0x718   : > { %v1125_v27 = vpop.f32.mrf.mxu3 }
 0x719   : > { %v1126_v0 = vadd.f32 %v1409_v26, %v1125_v27 }
 0x71b   : > { %v1128_v28 = vadd.f32 %v1126_v0, %v1953_v18 }
 0x71d   : > { %1129 = vst.msk [vmem:[%s517_s12] sm:$0xff] %vm523_vm0, %v1128_v28 }
 0x71e   : > { %1585 = shalt.err (!%p1582_p0)
}
 0x71f   : > { %1307 = dma.vmem_to_hbm [thread:$0]  (%p1825_p3), %s1145_s28, 128, %s1147_s16, %s1131_s18  }
 0x720 PF: > { %s2084_s13 = sld [smem:[#allocation17_spill]]  ;;  %p1324_p5 = pnand %p1263_p9, %p1785_p6 }
 0x722   : > { %p1325_p7 = pneg %p1324_p5 }
 0x726   : > { %s1158_s24 = sand.u32 1, %s2084_s13  }
 0x727   : > { %s1159_s12 = scalar_lea.sflag [#allocation6], %s1158_s24 }
 0x728   : > { %1623 = dma.done.wait (%p1325_p7), %s1159_s12, 128  }
 0x729   : > { %1625 = vsyncadd (%p1325_p7), %s1159_s12, 4294967168  ;;  %s31_s30 = sadd.s32 1, %s1648_s30   ;;  %s2086_s25 = smov %s1632_s26 }
 0x72a   : > { %p28_p10 = scmp.ge.s32.totalorder %s31_s30, 4   ;;  %s2087_s26 = smov %s1636_s27 }
 0x72b   : > { %s2088_s27 = smov %s1841_s17  ;;  %s2089_s28 = smov %s1644_s29 }
 0x72c   : > { %s2090_s29 = smov %s2092_s9  ;;  %30 = sbr.rel (!%p28_p10) target bundleno = 14 (0xe), region = 134 }
 0x731   :  { %1165 = vsyncpa [#allocation5], 1 }
 0x732   :  { %1167 = vsyncpa [#allocation5 + $0x1], 1 }
 0x733   :  { %1168 = vsyncpa [#allocation8], 1 }
 0x734   :  { %1169 = vsyncpa [#allocation11], 1 }
 0x735   :  { %1170 = vsyncpa [#allocation6], 1 }
 0x736   :  { %1172 = vsyncpa [#allocation6 + $0x1], 1 }

// kernel: tpu_custom_call.1
= control target key start
LH: loop header
LB: loop body
LE: loop exit
PB: predicated region body
PF: predicated region fallthrough
CT: control target
= control target key end

     0   :  { %s2041_s0 = inlined_call_operand.hbm [shape: f32[2,8,32], index: 0, kind: input, shape index: {}]   ;;  %s2042_s1 = inlined_call_operand.hbm [shape: f32[2,32], index: 1, kind: input, shape index: {}]   ;;  %s2043_s2 = inlined_call_operand.vmem [shape: f32[32,32], index: 2, kind: input, shape index: {}]   ;;  %s2044_s3 = inlined_call_operand.vmem [shape: f32[1,32], index: 3, kind: input, shape index: {}]   ;;  %s2045_s4 = inlined_call_operand.vmem [shape: f32[32,64], index: 4, kind: input, shape index: {}]   ;;  %s2046_s5 = inlined_call_operand.hbm [shape: f32[1,64], index: 5, kind: input, shape index: {}]   ;;  %s2047_s6 = inlined_call_operand.vmem [shape: f32[32,32], index: 6, kind: input, shape index: {}]   ;;  %s2048_s7 = inlined_call_operand.vmem [shape: f32[1,32], index: 7, kind: input, shape index: {}]   ;;  %s2049_s8 = inlined_call_operand.vmem [shape: f32[2,32], index: 8, kind: input, shape index: {}]   ;;  %s2050_s9 = inlined_call_operand.hbm [shape: f32[32,64], index: 9, kind: input, shape index: {}]   ;;  %s2051_s10 = inlined_call_operand.vmem [shape: f32[1,64], index: 10, kind: input, shape index: {}]   ;;  %s2052_s11 = inlined_call_operand.vmem [shape: f32[64,32], index: 11, kind: input, shape index: {}]   ;;  %s2053_s12 = inlined_call_operand.vmem [shape: f32[1,32], index: 12, kind: input, shape index: {}]   ;;  %s2054_s13 = inlined_call_operand.hbm [shape: f32[2,8,32], index: 13, kind: output, shape index: {}]  }
   0x1   :  { %2060 = sst [smem:[#allocation21_spill]] %s2042_s1 }
   0x2   :  { %2061 = sst [smem:[#allocation22_spill]] %s2046_s5 }
   0x3   :  { %2062 = sst [smem:[#allocation23_spill]] %s2050_s9 }
   0x4   :  { %2063 = sst [smem:[#allocation24_spill]] %s2053_s12 }
   0x5   :  { %2064 = sst [smem:[#allocation25_spill]] %s2054_s13 }
   0x6   :  { %18 = vsyncpa [#allocation5], 0 }
   0x7   :  { %20 = vsyncpa [#allocation5 + $0x1], 0 }
   0x8   :  { %21 = vsyncpa [#allocation8], 0 }
   0x9   :  { %22 = vsyncpa [#allocation11], 0 }
   0xa   :  { %23 = vsyncpa [#allocation6], 0 }
   0xb   :  { %25 = vsyncpa [#allocation6 + $0x1], 0  ;;  %s1736_s25 = smov 0   ;;  %s1738_s26 = smov 0  }
   0xc   :  { %s1740_s27 = smov 0   ;;  %s1742_s28 = smov 0  }
   0xd   :  { %s1744_s29 = smov 0   ;;  %s1746_s30 = smov 0  }
   0xe LB: > { %2065 = sst [smem:[#allocation17_spill]] %s1628_s25  ;;  %s1257_s14 = sadd.s32 4294967295, %s1648_s30   ;;  %s1648_s30 = sphi %s1746_s30, %s31_s30   ;;  %s1644_s29 = sphi %s1744_s29, %s2090_s29   ;;  %s1640_s28 = sphi %s1742_s28, %s2089_s28   ;;  %s1636_s27 = sphi %s1740_s27, %s2088_s27   ;;  %s1632_s26 = sphi %s1738_s26, %s2087_s26   ;;  %s1628_s25 = sphi %s1736_s25, %s2086_s25  }
   0xf   : > { %2066 = sst [smem:[#allocation18_spill]] %s1640_s28  ;;  %s1258_s15 = sadd.s32 4294967294, %s1648_s30  }
  0x10   : > { %p63_p0 = scmp.ne.s32.totalorder %s1632_s26, %s1628_s25  ;;  %p1770_p1 = scmp.eq.s32.totalorder %s1257_s14, 0 }
  0x11   : > { %p1774_p2 = scmp.eq.s32.totalorder %s1257_s14, 1  ;;  %p347_p3 = scmp.eq.s32.totalorder %s1258_s15, 1 }
  0x12   : > { %p1780_p4 = por %p1770_p1, %p63_p0  ;;  %p1259_p5 = scmp.ge.s32.totalorder %s1648_s30, 1 }
  0x13   : > { %p1785_p6 = por %p347_p3, %p63_p0  ;;  %p354_p7 = scmp.lt.s32.totalorder %s1648_s30, 3 }
  0x14   : > { %s2072_s1 = sld [smem:[#allocation21_spill]]  ;;  %p1263_p9 = scmp.ge.s32.totalorder %s1648_s30, 2 }
  0x15   : > { %s2070_s19 = scalar_select %p1785_p6, 1, 0 }
  0x16   : > { %p1793_p8 = pnand %p1259_p5, %p354_p7  ;;  %s1650_s24 = smov [#allocation7]  }
  0x17   : > { %2071 = sst [smem:[#allocation19_spill]] %s2070_s19  ;;  %s368_s14 = sshll.u32 %s1650_s24, 4  ;;  %s369_s14 = int_to_ptr.vmem [resolvable:$true] %s368_s14 }
  0x18   : > { %p1309_p10 = pneg %p1793_p8  ;;  %s2074_s5 = sld [smem:[#allocation22_spill]] }
  0x19   : > { %s2076_s9 = sld [smem:[#allocation23_spill]]  ;;  %s1651_s13 = smov [#allocation9]  }
  0x1a   : > { %s366_s22 = sshll.u32 %s2072_s1, 4  ;;  %p1805_p11 = pnand %p1309_p10, %p1770_p1  ;;  %s367_s22 = int_to_ptr.hbm [resolvable:$true] %s366_s22 }
  0x1b   : > { %s389_s25 = sshll.u32 %s1651_s13, 4  ;;  %s1652_s15 = smov [#allocation10]   ;;  %s390_s25 = int_to_ptr.vmem [resolvable:$true] %s389_s25 }
  0x1c   : > { %1312 = dma.hbm_to_vmem [thread:$0]  (!%p1805_p11), %s367_s22, 32, %s369_s14, [#allocation8]  }
  0x1d   : > { %s1653_s1 = smov 128   ;;  %s1654_s21 = smov 8  }
  0x1e   : > { %s387_s19 = sshll.u32 %s2074_s5, 4  ;;  %s409_s5 = sshll.u32 %s1652_s15, 4  ;;  %s388_s19 = int_to_ptr.hbm [resolvable:$true] %s387_s19  ;;  %s410_s5 = int_to_ptr.vmem [resolvable:$true] %s409_s5 }
  0x1f   : > { %s407_s24 = sshll.u32 %s2076_s9, 4  ;;  %s50_s13 = sadd.s32 1, %s1636_s27  ;;  %s408_s24 = int_to_ptr.hbm [resolvable:$true] %s407_s24 }
  0x20   : > { %1315 = dma.hbm_to_vmem [thread:$0]  (!%p1805_p11), %s388_s19, 16, %s390_s25, [#allocation8]  }
  0x21   : > { %1318 = dma.hbm_to_vmem [thread:$0]  (!%p1805_p11), %s408_s24, 512, %s410_s5, [#allocation11], %s1653_s1, %s1653_s1, %s1654_s21  }
  0x22   : > { %s43_s9 = sadd.s32 1, %s1644_s29  ;;  %p57_p12 = scmp.ne.s32.totalorder %s1636_s27, %s1632_s26 }
  0x23   : > { %p45_p13 = scmp.ge.s32.totalorder %s43_s9, 2  ;;  %p58_p0 = scmp.eq.s32.totalorder %s1648_s30, 0 }
  0x24   : > { %p1825_p3 = por %p1774_p2, %p57_p12  ;;  %p1330_p5 = scmp.lt.s32.totalorder %s1648_s30, 2 }
  0x25   : > { %s2092_s9 = smov (%p45_p13, %s43_s9), 0  ;;  %p1832_p7 = por %p58_p0, %p57_p12 }
  0x26   : > { %s2077_s22 = scalar_select %p1825_p3, 1, 0 }
  0x27   : > { %s432_s5 = sand.u32 1, %s1636_s27   ;;  %s47_s14 = ssub.s32 %s1644_s29, %s2092_s9 }
  0x28   : > { %2078 = sst [smem:[#allocation20_spill]] %s2077_s22  ;;  %p48_p10 = scmp.eq.s32.totalorder %s47_s14, 0 }
  0x29   : > { %s1264_s20 = sshll.u32 %s432_s5, 3  ;;  %s1265_s24 = sshll.u32 %s1644_s29, 3 }
  0x2a   : > { %s1841_s17 = scalar_select %p48_p10, %s1636_s27, %s50_s13  }
  0x2b   : > { %s440_s1 = scalar_lea.hbm %s2041_s0, %s1265_s24  ;;  %s436_s21 = scalar_lea.vmem [#allocation4], %s1264_s20 }
  0x2c   : > { %s444_s22 = sshll.u32 %s436_s21, 4  ;;  %s442_s12 = sshll.u32 %s440_s1, 4  ;;  %s445_s22 = int_to_ptr.vmem [resolvable:$true] %s444_s22  ;;  %s443_s12 = int_to_ptr.hbm [resolvable:$true] %s442_s12 }
  0x2d   : > { %p1320_p2 = pnand %p1330_p5, %p1832_p7  ;;  %s433_s28 = scalar_lea.sflag [#allocation5], %s432_s5 }
  0x2e   : > { %453 = sbr.rel (%p1793_p8) target bundleno = 1824 (0x720), region = 72  ;;  %s1853_s13 = sand.u32 (!%p1793_p8), 1, %s1632_s26  }
  0x2f   : > { %1322 = dma.hbm_to_vmem [thread:$0]  (!%p1320_p2), %s443_s12, 128, %s445_s22, %s433_s28  }
  0x30   : > { %s1267_s14 = sshll.u32 (!%p1793_p8), %s1853_s13, 3  ;;  %s456_s20 = scalar_lea.sflag (!%p1793_p8), [#allocation5], %s1853_s13 }
  0x31   : > { %s459_s24 = scalar_lea.vmem (!%p1793_p8), [#allocation4], %s1267_s14 }
  0x33   : > { %1611 = dma.done.wait (%p1780_p4), %s456_s20, 128  }
  0x34   : > { %1613 = vsyncadd (%p1780_p4), %s456_s20, 4294967168 }
  0x35   : > { %1615 = dma.done.wait (%p1770_p1), [#allocation8], 48  }
  0x36   : > { %1617 = vsyncadd (%p1770_p1), [#allocation8], 4294967248 }
  0x37   : > { %1619 = dma.done.wait (%p1770_p1), [#allocation11], 512  }
  0x38   : > { %1621 = vsyncadd (%p1770_p1), [#allocation11], 4294966784  ;;  %vm523_vm0 = vcmask 261120   ;;  %v1871_v0 = vld [vmem:[%s459_s24] sm:$0xff]  ;;  %v1655_v2 = vmov 32.0   ;;  %v560_v21 = vld [vmem:[%s2045_s4 + $0x8] sm:$0xff] }
  0x39   : > { %v524_v1 = vsel %vm523_vm0, %v1871_v0, 0.0  ;;  %1410 = vrcp.f32 %v1655_v2  ;;  %v562_v19 = vld [vmem:[%s2045_s4 + $0x18] sm:$0xff]  ;;  %v561_v20 = vld [vmem:[%s2045_s4 + $0x10] sm:$0xff]  ;;  %v559_v22 = vld [vmem:[%s2045_s4] sm:$0xff]  ;;  %vm590_vm8 = vcmask 523264   ;;  %vm664_vm9 = vcmask 64512  }
  0x3a   : > { %525 = vadd.xlane.f32.xlu0 %v524_v1  ;;  %582 = vmatpush.msra.mxu0 %v562_v19  ;;  %v634_v23 = vld [vmem:[%s2043_s2 + $0x18] sm:$0xff]  ;;  %v633_v24 = vld [vmem:[%s2043_s2 + $0x10] sm:$0xff]  ;;  %v632_v25 = vld [vmem:[%s2043_s2 + $0x8] sm:$0xff]  ;;  %s1656_s23 = smov 104   ;;  %s1657_s22 = smov 120   ;;  %vm806_vm10 = vcmask 130112  }
  0x3b   : > { %654 = vmatpush.msra.mxu1 %v634_v23  ;;  %v631_v28 = vld [vmem:[%s2043_s2] sm:$0xff]  ;;  %s1658_s19 = smov 96   ;;  %s1659_s5 = smov 112   ;;  %vm882_vm11 = vcmask 195712   ;;  %vm958_vm12 = vcmask 261312  }
  0x3c   : > { %583 = vmatpush.msra.mxu0 %v561_v20  ;;  %v1399_v41 = vld [vmem:[#allocation7] ss:$0 sm:$0xff]  ;;  %v1400_v45 = vld [vmem:[#allocation7 + $0x1] ss:$0 sm:$0xff]  ;;  %v1403_v57 = vld [vmem:[#allocation9] ss:$0 sm:$0xff] }
  0x3d   : > { %655 = vmatpush.msra.mxu1 %v633_v24  ;;  %v1401_v51 = vld [vmem:[#allocation7] ss:$0 sm:$0xff]  ;;  %v1402_v54 = vld [vmem:[#allocation7 + $0x1] ss:$0 sm:$0xff]  ;;  %s1660_s25 = smov 88   ;;  %s1661_s15 = smov 72  }
  0x3e   : > { %584 = vmatpush.msra.mxu0 %v560_v21  ;;  %v1404_v60 = vld [vmem:[%s2044_s3] ss:$0 sm:$0xff]  ;;  %s1662_s1 = smov 80   ;;  %s1663_s21 = smov 8  }
  0x3f   : > { %v1411_v3 = vpop.eup %1410  ;;  %656 = vmatpush.msra.mxu1 %v632_v25  ;;  %s1664_s20 = smov 24   ;;  %s1665_s24 = smov 16  }
  0x40   : > { %v528_v4 = vmul.f32 32.0, %v1411_v3  ;;  %vm532_vm1 = vweird.f32 %v1411_v3  ;;  %585 = vmatpush.msra.mxu0 %v559_v22  ;;  %s517_s12 = scalar_lea.vmem [#allocation12], %s1267_s14  ;;  %s1131_s18 = scalar_lea.sflag [#allocation6], %s1853_s13 }
  0x41   : > { %657 = vmatpush.msra.mxu1 %v631_v28  ;;  %s1144_s28 = sshll.u32 %s517_s12, 4  ;;  %s1145_s28 = int_to_ptr.vmem [resolvable:$true] %s1144_s28 }
  0x42   : > { %597 = vadd.xlane.f32.xlu0 %v524_v1  ;;  %v529_v5 = vsub.f32 1.0, %v528_v4 }
  0x44   : > { %v530_v6 = vmul.f32 %v1411_v3, %v529_v5 }
  0x46   : > { %v531_v7 = vadd.f32 %v1411_v3, %v530_v6 }
  0x48   : > { %v1875_v8 = vsel %vm532_vm1, %v1411_v3, %v531_v7 }
  0xad   : > { %v526_v9 = vpop.xlane.xlu0 %525 }
  0xae   : > { %v534_v10 = vmul.f32 %v1875_v8, %v526_v9 }
  0xb0   : > { %v535_v11 = vsub.f32 %v1871_v0, %v534_v10 }
  0xb2   : > { %v536_v12 = vmul.f32 %v535_v11, %v535_v11 }
  0xb4   : > { %v537_v13 = vsel %vm523_vm0, %v536_v12, 0.0 }
  0xb5   : > { %538 = vadd.xlane.f32.xlu1 %v537_v13  ;;  %v598_v14 = vpop.xlane.xlu0 %597 }
  0xb6   : > { %v606_v15 = vmul.f32 %v598_v14, %v1875_v8 }
  0xb8   : > { %v607_v16 = vsub.f32 %v1871_v0, %v606_v15 }
  0xba   : > { %v608_v17 = vmul.f32 %v607_v16, %v607_v16 }
  0xbc   : > { %v609_v18 = vsel %vm523_vm0, %v608_v17, 0.0 }
  0xbd   : > { %610 = vadd.xlane.f32.xlu1 %v609_v18 }
 0x128   : > { %v539_v26 = vpop.xlane.xlu1 %538 }
 0x129   : > { %v540_v27 = vmul.f32 %v539_v26, %v1875_v8 }
 0x12b   : > { %v541_v29 = vadd.f32 1e-05, %v540_v27 }
 0x12d   : > { %1412 = vrsqrt.f32 %v541_v29  ;;  %vm548_vm3 = vweird.f32 %v541_v29 }
 0x130   : > { %v611_v30 = vpop.xlane.xlu1 %610 }
 0x131   : > { %v612_v31 = vmul.f32 %v611_v30, %v1875_v8 }
 0x133   : > { %v1413_v32 = vpop.eup %1412  ;;  %v613_v33 = vadd.f32 1e-05, %v612_v31 }
 0x134   : > { %v543_v34 = vmul.f32 %v1413_v32, %v541_v29  ;;  %vm549_vm2 = vweird.f32 %v1413_v32 }
 0x135   : > { %1414 = vrsqrt.f32 %v613_v33  ;;  %vm550_vm4 = vmor %vm548_vm3, %vm549_vm2  ;;  %vm620_vm6 = vweird.f32 %v613_v33 }
 0x136   : > { %v544_v35 = vmul.f32 %v1413_v32, %v543_v34 }
 0x138   : > { %v545_v36 = vmul.f32 0.5, %v544_v35 }
 0x13a   : > { %v546_v37 = vsub.f32 1.5, %v545_v36 }
 0x13b   : > { %v1415_v38 = vpop.eup %1414 }
 0x13c   : > { %v547_v39 = vmul.f32 %v1413_v32, %v546_v37  ;;  %v615_v40 = vmul.f32 %v1415_v38, %v613_v33  ;;  %vm621_vm5 = vweird.f32 %v1415_v38 }
 0x13d   : > { %vm622_vm7 = vmor %vm620_vm6, %vm621_vm5 }
 0x13e   : > { %v551_v42 = vsel %vm550_vm4, %v1413_v32, %v547_v39  ;;  %v616_v43 = vmul.f32 %v1415_v38, %v615_v40 }
 0x13f   : > { %v552_v44 = vmul.f32 %v551_v42, %v535_v11 }
 0x140   : > { %v617_v46 = vmul.f32 0.5, %v616_v43 }
 0x141   : > { %v555_v47 = vmul.f32 %v1399_v41, %v552_v44 }
 0x142   : > { %v618_v48 = vsub.f32 1.5, %v617_v46 }
 0x143   : > { %v558_v49 = vadd.f32 %v1400_v45, %v555_v47 }
 0x144   : > { %v619_v50 = vmul.f32 %v1415_v38, %v618_v48 }
 0x145   : > { %1272 = vmatmul.msk.f32.vlgmr.msra.gmra.mxu0 %vm523_vm0, %v558_v49 }
 0x146   : > { %v623_v52 = vsel %vm622_vm7, %v1415_v38, %v619_v50 }
 0x147   : > { %v624_v53 = vmul.f32 %v623_v52, %v607_v16 }
 0x149   : > { %v627_v55 = vmul.f32 %v1401_v51, %v624_v53 }
 0x14b   : > { %v630_v56 = vadd.f32 %v1402_v54, %v627_v55 }
 0x14d   : > { %1273 = vmatmul.msk.f32.vlgmr.msra.gmra.mxu1 %vm523_vm0, %v630_v56 }
 0x1c2   : > { %v587_v58 = vpop.f32.mrf.mxu0 }
 0x1c3   : > { %v588_v59 = vadd.f32 %v1403_v57, %v587_v58 }
 0x1c5   : > { %591 = vst.msk [vmem:[#allocation2] sm:$0xff] %vm590_vm8, %v588_v59 }
 0x1ca   : > { %v659_v61 = vpop.f32.mrf.mxu1 }
 0x1cb   : > { %v660_v62 = vadd.f32 %v1404_v60, %v659_v61 }
 0x1cc   : > { %v884_v63 = vld [vmem:[#allocation2] sm:$0xff] }
 0x1cd   : > { %v662_v1 = vmul.f32 0.35355338, %v660_v62  ;;  %888 = vrot.lane.b32.xlu0 %v884_v63, %s1656_s23  ;;  %736 = vrot.lane.b32.xlu2 %v884_v63, %s1657_s22 }
 0x1ce   : > { %1274 = vmatpush.xpose.msk.msra.mxu2 %vm664_vm9, %v884_v63 }
 0x1cf   : > { %885 = vrot.lane.b32.xlu1 %v662_v1, %s1656_s23  ;;  %s2080_s23 = sld [smem:[#allocation18_spill]] }
 0x1d1   : > { %1275 = vmatmul.msk.f32.vlgmr.msra.gmra.mxu2 %vm664_vm9, %v662_v1 }
 0x1d5   : > { %733 = vrot.lane.b32.xlu2 %v662_v1, %s1657_s22  ;;  %s1290_s22 = sshll.u32 %s2080_s23, 3 }
 0x1d7   : > { %704 = vrot.lane.b32.xlu1 %v884_v63, %s1658_s19 }
 0x1dd   : > { %812 = vrot.lane.b32.xlu2 %v884_v63, %s1659_s5 }
 0x1e5   : > { %809 = vrot.lane.b32.xlu2 %v662_v1, %s1659_s5 }
 0x227   : > { %v737_v2 = vpop.permute.xlu2 %736 }
 0x228   : > { %1277 = vmatpush.xpose.msk.msra.mxu3 %vm664_vm9, %v737_v2 }
 0x22f   : > { %v734_v3 = vpop.permute.xlu2 %733 }
 0x230   : > { %1278 = vmatmul.msk.f32.vlgmr.msra.gmra.mxu3 %vm664_vm9, %v734_v3 }
 0x237   : > { %v813_v4 = vpop.permute.xlu2 %812 }
 0x238   : > { %1280 = vmatpush.xpose.msk.msrb.mxu0 %vm664_vm9, %v813_v4 }
 0x23f   : > { %v810_v5 = vpop.permute.xlu2 %809  ;;  %v889_v6 = vpop.permute.xlu0 %888 }
 0x240   : > { %1281 = vmatmul.msk.f32.vlgmr.msrb.gmra.mxu0 %vm664_vm9, %v810_v5  ;;  %1283 = vmatpush.xpose.msk.msrb.mxu3 %vm664_vm9, %v889_v6 }
 0x241   : > { %v886_v7 = vpop.permute.xlu1 %885 }
 0x243   : > { %1284 = vmatmul.msk.f32.vlgmr.msrb.gmra.mxu3 %vm664_vm9, %v886_v7  ;;  %v964_v7 = vld [vmem:[%s2047_s6 + $0x18] sm:$0xff] }
 0x244   : > { %984 = vmatpush.msra.mxu0 %v964_v7 }
 0x249   : > { %v705_v9 = vpop.permute.xlu1 %704 }
 0x24a   : > { %725 = vmatpush.msrb.mxu2 %v705_v9  ;;  %v963_v9 = vld [vmem:[%s2047_s6 + $0x10] sm:$0xff] }
 0x24b   : > { %985 = vmatpush.msra.mxu0 %v963_v9 }
 0x254   : > { %v688_v10 = vpop.f32.mrf.mxu2 }
 0x255   : > { %v691_v11 = vsel %vm664_vm9, %v688_v10, -inf }
 0x256   : > { %692 = vmax.xlane.f32.xlu2 %v691_v11  ;;  %v961_v11 = vld [vmem:[%s2047_s6] sm:$0xff] }
 0x26e   : > { %775 = vrot.lane.b32.xlu2 %v884_v63, %s1660_s25  ;;  %s2081_s25 = sld [smem:[#allocation24_spill]] }
 0x2b3   : > { %v759_v13 = vpop.f32.mrf.mxu3 }
 0x2b4   : > { %v762_v16 = vsel %vm664_vm9, %v759_v13, -inf }
 0x2bd   : > { %v835_v12 = vpop.f32.mrf.mxu0 }
 0x2be   : > { %v838_v14 = vsel %vm664_vm9, %v835_v12, -inf }
 0x2bf   : > { %839 = vmax.xlane.f32.xlu0 %v838_v14 }
 0x2c6   : > { %v911_v15 = vpop.f32.mrf.mxu3 }
 0x2c7   : > { %763 = vmax.xlane.f32.xlu0 %v762_v16  ;;  %v914_v17 = vsel %vm664_vm9, %v911_v15, -inf }
 0x2c8   : > { %915 = vmax.xlane.f32.xlu1 %v914_v17 }
 0x2c9   : > { %v693_v18 = vpop.xlane.xlu2 %692 }
 0x2ca   : > { %v694_v19 = vsub.f32 %v688_v10, %v693_v18  ;;  %v962_v10 = vld [vmem:[%s2047_s6 + $0x8] sm:$0xff] }
 0x2cb   : > { %986 = vmatpush.msra.mxu0 %v962_v10 }
 0x2cc   : > { %v695_v20 = vmul.f32 1.442695, %v694_v19 }
 0x2cd   : > { %987 = vmatpush.msra.mxu0 %v961_v11 }
 0x2ce   : > { %1416 = vpow2.f32 %v695_v20 }
 0x2d1   : > { %v776_v21 = vpop.permute.xlu2 %775 }
 0x2d2   : > { %796 = vmatpush.msra.mxu2 %v776_v21 }
 0x2d4   : > { %v1417_v22 = vpop.eup %1416 }
 0x2d5   : > { %1276 = vmatmul.msk.f32.vlgmr.msrb.gmra.mxu2 %vm664_vm9, %v1417_v22  ;;  %v697_v39 = vsel %vm664_vm9, %v1417_v22, 0.0 }
 0x2db   : > { %927 = vrot.lane.b32.xlu0 %v884_v63, %s1661_s15 }
 0x2e1   : > { %851 = vrot.lane.b32.xlu1 %v884_v63, %s1662_s1 }
 0x332   : > { %v840_v23 = vpop.xlane.xlu0 %839 }
 0x333   : > { %v841_v24 = vsub.f32 %v835_v12, %v840_v23 }
 0x335   : > { %v842_v25 = vmul.f32 1.442695, %v841_v24 }
 0x337   : > { %1418 = vpow2.f32 %v842_v25  ;;  %v1024_v25 = vld [vmem:[#allocation10 + $0x18] sm:$0xff] }
 0x33a   : > { %v764_v26 = vpop.xlane.xlu0 %763 }
 0x33b   : > { %v765_v27 = vsub.f32 %v759_v13, %v764_v26  ;;  %v916_v28 = vpop.xlane.xlu1 %915  ;;  %v1023_v26 = vld [vmem:[#allocation10 + $0x10] sm:$0xff] }
 0x33c   : > { %v917_v29 = vsub.f32 %v911_v15, %v916_v28  ;;  %v1405_v15 = vld [vmem:[%s2048_s7] ss:$0 sm:$0xff] }
 0x33d   : > { %v1419_v30 = vpop.eup %1418  ;;  %v766_v31 = vmul.f32 1.442695, %v765_v27  ;;  %v1022_v27 = vld [vmem:[#allocation10 + $0x8] sm:$0xff] }
 0x33e   : > { %v918_v32 = vmul.f32 1.442695, %v917_v29  ;;  %v844_v33 = vsel %vm664_vm9, %v1419_v30, 0.0 }
 0x33f   : > { %1420 = vpow2.f32 %v766_v31  ;;  %845 = vadd.xlane.f32.xlu0 %v844_v33 }
 0x340   : > { %1422 = vpow2.f32 %v918_v32 }
 0x345   : > { %v1421_v34 = vpop.eup %1420 }
 0x346   : > { %v1423_v35 = vpop.eup %1422  ;;  %1279 = vmatmul.msk.f32.vlgmr.msra.gmra.mxu2 %vm664_vm9, %v1421_v34  ;;  %v768_v36 = vsel %vm664_vm9, %v1421_v34, 0.0 }
 0x347   : > { %769 = vadd.xlane.f32.xlu2 %v768_v36  ;;  %v920_v37 = vsel %vm664_vm9, %v1423_v35, 0.0 }
 0x348   : > { %921 = vadd.xlane.f32.xlu1 %v920_v37  ;;  %v1406_v37 = vld [vmem:[%s2049_s8] ss:$0 sm:$0xff] }
 0x34d   : > { %v928_v38 = vpop.permute.xlu0 %927 }
 0x34e   : > { %948 = vmatpush.msrb.mxu2 %v928_v38 }
 0x34f   : > { %698 = vadd.xlane.f32.xlu2 %v697_v39  ;;  %1285 = vmatmul.msk.f32.vlgmr.msrb.gmra.mxu2 %vm664_vm9, %v1423_v35 }
 0x353   : > { %v852_v40 = vpop.permute.xlu1 %851 }
 0x354   : > { %872 = vmatpush.msrb.mxu1 %v852_v40 }
 0x355   : > { %1282 = vmatmul.msk.f32.vlgmr.msrb.gmra.mxu1 %vm664_vm9, %v1419_v30 }
 0x356   : > { %1044 = vmatpush.msra.mxu1 %v1024_v25 }
 0x358   : > { %v727_v45 = vpop.f32.mrf.mxu2  ;;  %1045 = vmatpush.msra.mxu1 %v1023_v26  ;;  %v1409_v26 = vld [vmem:[%s2081_s25] ss:$0 sm:$0xff] }
 0x35a   : > { %1046 = vmatpush.msra.mxu1 %v1022_v27 }
 0x3b2   : > { %v846_v42 = vpop.xlane.xlu0 %845 }
 0x3ba   : > { %v770_v41 = vpop.xlane.xlu2 %769 }
 0x3bb   : > { %1424 = vrcp.f32 %v770_v41  ;;  %v922_v43 = vpop.xlane.xlu1 %921 }
 0x3bc   : > { %1426 = vrcp.f32 %v846_v42 }
 0x3bd   : > { %1428 = vrcp.f32 %v922_v43 }
 0x3c1   : > { %v1425_v44 = vpop.eup %1424 }
 0x3c2   : > { %v772_v46 = vmul.f32 %v1425_v44, %v770_v41  ;;  %v699_v47 = vpop.xlane.xlu2 %698  ;;  %v1427_v49 = vpop.eup %1426 }
 0x3c3   : > { %1430 = vrcp.f32 %v699_v47  ;;  %v1429_v50 = vpop.eup %1428  ;;  %v848_v53 = vmul.f32 %v1427_v49, %v846_v42  ;;  %v1408_v42 = vld [vmem:[%s2051_s10] ss:$0 sm:$0xff] }
 0x3c4   : > { %v773_v48 = vsub.f32 2.0, %v772_v46  ;;  %v924_v54 = vmul.f32 %v1429_v50, %v922_v43 }
 0x3c5   : > { %v849_v59 = vsub.f32 2.0, %v848_v53 }
 0x3c6   : > { %v774_v51 = vmul.f32 %v1425_v44, %v773_v48  ;;  %v925_v60 = vsub.f32 2.0, %v924_v54 }
 0x3c7   : > { %v850_v63 = vmul.f32 %v1427_v49, %v849_v59  ;;  %v1099_v49 = vld [vmem:[%s2052_s11 + $0x38] sm:$0xff] }
 0x3c8   : > { %v926_v1 = vmul.f32 %v1429_v50, %v925_v60  ;;  %1116 = vmatpush.msra.mxu3 %v1099_v49  ;;  %v1098_v50 = vld [vmem:[%s2052_s11 + $0x30] sm:$0xff] }
 0x3c9   : > { %v1431_v52 = vpop.eup %1430  ;;  %v798_v55 = vpop.f32.mrf.mxu2 }
 0x3ca   : > { %v701_v56 = vmul.f32 %v1431_v52, %v699_v47  ;;  %v801_v57 = vmul.f32 %v798_v55, %v774_v51  ;;  %1117 = vmatpush.msra.mxu3 %v1098_v50  ;;  %v1097_v51 = vld [vmem:[%s2052_s11 + $0x28] sm:$0xff]  ;;  %v1095_v55 = vld [vmem:[%s2052_s11 + $0x18] sm:$0xff] }
 0x3cc   : > { %v702_v58 = vsub.f32 2.0, %v701_v56  ;;  %803 = vrot.lane.b32.xlu2 %v801_v57, %s1663_s21  ;;  %1118 = vmatpush.msra.mxu3 %v1097_v51  ;;  %v1094_v57 = vld [vmem:[%s2052_s11 + $0x10] sm:$0xff]  ;;  %s2082_s21 = sld [smem:[#allocation25_spill]] }
 0x3ce   : > { %v703_v61 = vmul.f32 %v1431_v52, %v702_v58  ;;  %v1096_v52 = vld [vmem:[%s2052_s11 + $0x20] sm:$0xff] }
 0x3cf   : > { %1119 = vmatpush.msra.mxu3 %v1096_v52 }
 0x3d0   : > { %v730_v62 = vmul.f32 %v727_v45, %v703_v61  ;;  %v1093_v61 = vld [vmem:[%s2052_s11 + $0x8] sm:$0xff] }
 0x3d1   : > { %1120 = vmatpush.msra.mxu3 %v1095_v55 }
 0x3d2   : > { %731 = vst.msk [vmem:[#allocation3] sm:$0xff] %vm664_vm9, %v730_v62  ;;  %v874_v2 = vpop.f32.mrf.mxu1  ;;  %v950_v3 = vpop.f32.mrf.mxu2  ;;  %v1092_v62 = vld [vmem:[%s2052_s11] sm:$0xff]  ;;  %s1578_s14 = scalar_lea.hbm %s2082_s21, 16 }
 0x3d3   : > { %v877_v4 = vmul.f32 %v874_v2, %v850_v63  ;;  %v953_v5 = vmul.f32 %v950_v3, %v926_v1  ;;  %1121 = vmatpush.msra.mxu3 %v1094_v57 }
 0x3d5   : > { %955 = vrot.lane.b32.xlu1 %v953_v5, %s1664_s20  ;;  %879 = vrot.lane.b32.xlu0 %v877_v4, %s1665_s24  ;;  %s1142_s24 = scalar_lea.hbm %s2082_s21, %s1290_s22 }
 0x3d6   : > { %1122 = vmatpush.msra.mxu3 %v1093_v61  ;;  %s1146_s16 = sshll.u32 %s1142_s24, 4  ;;  %s1147_s16 = int_to_ptr.hbm [resolvable:$true] %s1146_s16 }
 0x3d7   : > { %s1572_s23 = sshra.s32 %s1147_s16, 4  ;;  %s1573_s23 = int_to_ptr.hbm [resolvable:$true] %s1572_s23 }
 0x3d8   : > { %1123 = vmatpush.msra.mxu3 %v1092_v62  ;;  %s1574_s19 = scalar_lea.hbm %s1573_s23, 8  ;;  %p1579_p11 = scmp.lt.s32.totalorder %s1573_s23, %s2082_s21 }
 0x3d9   : > { %p1575_p1 = scmp.ne.s32.totalorder %s1573_s23, %s1574_s19  ;;  %p1580_p12 = scmp.lt.s32.totalorder %s1578_s14, %s1574_s19 }
 0x3db   : > { %p1576_p4 = pnand %p1575_p1, %p1825_p3  ;;  %p1581_p13 = por %p1580_p12, %p1579_p11 }
 0x3dd   : > { %p1577_p8 = pneg %p1576_p4 }
 0x3df   : > { %p1582_p0 = pnand %p1581_p13, %p1577_p8 }
 0x426   : > { %v804_v6 = vpop.permute.xlu2 %803 }
 0x427   : > { %807 = vst.msk [vmem:[#allocation3] sm:$0xff] %vm806_vm10, %v804_v6 }
 0x447   : > { %v956_v12 = vpop.permute.xlu1 %955  ;;  %v880_v13 = vpop.permute.xlu0 %879 }
 0x448   : > { %883 = vst.msk [vmem:[#allocation3] sm:$0xff] %vm882_vm11, %v880_v13 }
 0x449   : > { %959 = vst.msk [vmem:[#allocation3] sm:$0xff] %vm958_vm12, %v956_v12 }
 0x450   : > { %v960_v14 = vld [vmem:[#allocation3] sm:$0xff] }
 0x451   : > { %1286 = vmatmul.msk.f32.vlgmr.msra.gmra.mxu0 %vm523_vm0, %v960_v14 }
 0x4ce   : > { %v989_v16 = vpop.f32.mrf.mxu0 }
 0x4cf   : > { %v990_v17 = vadd.f32 %v1405_v15, %v989_v16 }
 0x4d1   : > { %v1953_v18 = vadd.f32 %v990_v17, %v1871_v0  ;;  %v1021_v0 = vld [vmem:[#allocation10] sm:$0xff] }
 0x4d2   : > { %1047 = vmatpush.msra.mxu1 %v1021_v0 }
 0x4d3   : > { %v993_v19 = vsel %vm523_vm0, %v1953_v18, 0.0 }
 0x4d4   : > { %994 = vadd.xlane.f32.xlu0 %v993_v19 }
 0x547   : > { %v995_v20 = vpop.xlane.xlu0 %994 }
 0x548   : > { %v996_v21 = vmul.f32 %v995_v20, %v1875_v8 }
 0x54a   : > { %v997_v22 = vsub.f32 %v1953_v18, %v996_v21 }
 0x54c   : > { %v998_v23 = vmul.f32 %v997_v22, %v997_v22 }
 0x54e   : > { %v999_v24 = vsel %vm523_vm0, %v998_v23, 0.0 }
 0x54f   : > { %1000 = vadd.xlane.f32.xlu2 %v999_v24 }
 0x5c2   : > { %v1001_v28 = vpop.xlane.xlu2 %1000 }
 0x5c3   : > { %v1002_v29 = vmul.f32 %v1001_v28, %v1875_v8  ;;  %v1407_v8 = vld [vmem:[%s2049_s8 + $0x1] ss:$0 sm:$0xff] }
 0x5c5   : > { %v1003_v30 = vadd.f32 1e-05, %v1002_v29 }
 0x5c7   : > { %1432 = vrsqrt.f32 %v1003_v30  ;;  %vm1010_vm14 = vweird.f32 %v1003_v30 }
 0x5cd   : > { %v1433_v31 = vpop.eup %1432 }
 0x5ce   : > { %v1005_v32 = vmul.f32 %v1433_v31, %v1003_v30  ;;  %vm1011_vm13 = vweird.f32 %v1433_v31 }
 0x5cf   : > { %vm1012_vm15 = vmor %vm1010_vm14, %vm1011_vm13 }
 0x5d0   : > { %v1006_v33 = vmul.f32 %v1433_v31, %v1005_v32 }
 0x5d2   : > { %v1007_v34 = vmul.f32 0.5, %v1006_v33 }
 0x5d4   : > { %v1008_v35 = vsub.f32 1.5, %v1007_v34 }
 0x5d6   : > { %v1009_v36 = vmul.f32 %v1433_v31, %v1008_v35 }
 0x5d8   : > { %v1013_v38 = vsel %vm1012_vm15, %v1433_v31, %v1009_v36 }
 0x5d9   : > { %v1014_v39 = vmul.f32 %v1013_v38, %v997_v22 }
 0x5db   : > { %v1017_v40 = vmul.f32 %v1406_v37, %v1014_v39 }
 0x5dd   : > { %v1020_v41 = vadd.f32 %v1407_v8, %v1017_v40 }
 0x5df   : > { %1287 = vmatmul.msk.f32.vlgmr.msra.gmra.mxu1 %vm523_vm0, %v1020_v41 }
 0x65c   : > { %v1049_v43 = vpop.f32.mrf.mxu1 }
 0x65d   : > { %v1050_v44 = vadd.f32 %v1408_v42, %v1049_v43 }
 0x65f   : > { %v1053_v45 = vmul.f32 0.70710677, %v1050_v44  ;;  %v1052_v23 = vmul.f32 0.5, %v1050_v44 }
 0x661   : > { %v1054_v46 = vand.u32 2147483647, %v1053_v45  ;;  %vm1087_vm5 = vcmp.lt.f32.partialorder %v1053_v45, 0.0 }
 0x663   : > { %v1055_v47 = vmul.f32 0.3275911, %v1054_v46  ;;  %v1081_v4 = vsub.f32 0.0, %v1054_v46 }
 0x665   : > { %v1056_v48 = vadd.f32 1.0, %v1055_v47  ;;  %v1082_v7 = vmul.f32 %v1081_v4, %v1054_v46 }
 0x667   : > { %1434 = vrcp.f32 %v1056_v48  ;;  %v1068_v58 = vand.u32 2147483648, %v1056_v48  ;;  %v1066_v60 = vand.u32 2147483647, %v1056_v48  ;;  %vm1062_vm2 = vweird.f32 %v1056_v48 }
 0x668   : > { %v1083_v11 = vmul.f32 1.442695, %v1082_v7 }
 0x669   : > { %v1069_v1 = vor.u32 1.1754944e-38, %v1068_v58  ;;  %vm1067_vm4 = vcmp.eq.f32.partialorder %v1066_v60, 8.507059e+37 }
 0x66a   : > { %1436 = vpow2.f32 %v1083_v11 }
 0x66d   : > { %v1435_v53 = vpop.eup %1434 }
 0x66e   : > { %v1058_v54 = vmul.f32 %v1435_v53, %v1056_v48  ;;  %vm1063_vm1 = vweird.f32 %v1435_v53 }
 0x66f   : > { %vm1064_vm3 = vmor %vm1062_vm2, %vm1063_vm1 }
 0x670   : > { %v1059_v56 = vsub.f32 1.0, %v1058_v54  ;;  %v1437_v17 = vpop.eup %1436 }
 0x672   : > { %v1060_v59 = vmul.f32 %v1435_v53, %v1059_v56 }
 0x674   : > { %v1061_v63 = vadd.f32 %v1435_v53, %v1060_v59 }
 0x676   : > { %v1065_v2 = vsel %vm1064_vm3, %v1435_v53, %v1061_v63 }
 0x677   : > { %v1070_v3 = vsel %vm1067_vm4, %v1069_v1, %v1065_v2 }
 0x678   : > { %v1072_v5 = vmul.f32 1.0614054, %v1070_v3 }
 0x67a   : > { %v1073_v6 = vadd.f32 -1.4531521, %v1072_v5 }
 0x67c   : > { %v1074_v9 = vmul.f32 %v1073_v6, %v1070_v3 }
 0x67e   : > { %v1075_v10 = vadd.f32 1.4214138, %v1074_v9 }
 0x680   : > { %v1076_v12 = vmul.f32 %v1075_v10, %v1070_v3 }
 0x682   : > { %v1077_v13 = vadd.f32 -0.28449672, %v1076_v12 }
 0x684   : > { %v1078_v14 = vmul.f32 %v1077_v13, %v1070_v3 }
 0x686   : > { %v1079_v15 = vadd.f32 0.2548296, %v1078_v14 }
 0x688   : > { %v1080_v16 = vmul.f32 %v1079_v15, %v1070_v3 }
 0x68a   : > { %v1085_v19 = vmul.f32 %v1437_v17, %v1080_v16 }
 0x68c   : > { %v1086_v20 = vsub.f32 1.0, %v1085_v19 }
 0x68e   : > { %v1088_v21 = vsub.f32 0.0, %v1086_v20 }
 0x690   : > { %v1089_v22 = vsel %vm1087_vm5, %v1088_v21, %v1086_v20 }
 0x691   : > { %v1090_v24 = vadd.f32 1.0, %v1089_v22 }
 0x693   : > { %v1091_v25 = vmul.f32 %v1090_v24, %v1052_v23 }
 0x695   : > { %1288 = vmatmul.msk.f32.vlgmr.msra.gmra.mxu3 %vm590_vm8, %v1091_v25 }
 0x718   : > { %v1125_v27 = vpop.f32.mrf.mxu3 }
 0x719   : > { %v1126_v0 = vadd.f32 %v1409_v26, %v1125_v27 }
 0x71b   : > { %v1128_v28 = vadd.f32 %v1126_v0, %v1953_v18 }
 0x71d   : > { %1129 = vst.msk [vmem:[%s517_s12] sm:$0xff] %vm523_vm0, %v1128_v28 }
 0x71e   : > { %1585 = shalt.err (!%p1582_p0)
}
 0x71f   : > { %1307 = dma.vmem_to_hbm [thread:$0]  (%p1825_p3), %s1145_s28, 128, %s1147_s16, %s1131_s18  }
 0x720 PF: > { %s2084_s13 = sld [smem:[#allocation17_spill]]  ;;  %p1324_p5 = pnand %p1263_p9, %p1785_p6 }
 0x722   : > { %p1325_p7 = pneg %p1324_p5 }
 0x726   : > { %s1158_s24 = sand.u32 1, %s2084_s13  }
 0x727   : > { %s1159_s12 = scalar_lea.sflag [#allocation6], %s1158_s24 }
 0x728   : > { %1623 = dma.done.wait (%p1325_p7), %s1159_s12, 128  }
 0x729   : > { %1625 = vsyncadd (%p1325_p7), %s1159_s12, 4294967168  ;;  %s31_s30 = sadd.s32 1, %s1648_s30   ;;  %s2086_s25 = smov %s1632_s26 }
 0x72a   : > { %p28_p10 = scmp.ge.s32.totalorder %s31_s30, 4   ;;  %s2087_s26 = smov %s1636_s27 }
 0x72b   : > { %s2088_s27 = smov %s1841_s17  ;;  %s2089_s28 = smov %s1644_s29 }
 0x72c   : > { %s2090_s29 = smov %s2092_s9  ;;  %30 = sbr.rel (!%p28_p10) target bundleno = 14 (0xe), region = 134 }
 0x731   :  { %1165 = vsyncpa [#allocation5], 1 }
 0x732   :  { %1167 = vsyncpa [#allocation5 + $0x1], 1 }
 0x733   :  { %1168 = vsyncpa [#allocation8], 1 }
 0x734   :  { %1169 = vsyncpa [#allocation11], 1 }
 0x735   :  { %1170 = vsyncpa [#allocation6], 1 }
 0x736   :  { %1172 = vsyncpa [#allocation6 + $0x1], 1 }

</bundles_post_ra>
